<compile_context>
chip_gen: v5e
topology: v5e:2x2
jax: 0.10.0
libtpu: 0.0.40
codegen_flags: <defaults>
</compile_context>

<pallas_src>
import numpy as np
import jax
import jax.numpy as jnp
from jax import lax
from jax.experimental import pallas as pl
from jax.experimental.pallas import tpu as pltpu


_VMEM = pl.BlockSpec(memory_space=pltpu.MemorySpace.VMEM)


# ------------------------------- Pallas kernel --------------------------------

def _fused_kernel(ids_ref, emb_ref, wx_ref, wh_ref, bg_ref,
                  wdec_ref, msel_ref, bsel_ref, coll_ref, bdec_ref, out_ref):
    """Fused embed -> merged BiLSTM -> triplet decoder.

    ids_ref : (2*T*Npad, 1) int32  token ids, forward-time-major rows then
                                   reverse-time-major rows.
    emb_ref : (V, D)    f32  embedding table.
    wx_ref  : (2D, 8H)  f32  input projection; rows 0:D act on forward-time x,
                             rows D:2D on reverse-time x (zeros enforce no mixing).
    wh_ref  : (2H, 8H)  f32  block-diagonal hidden projection (fwd rows / bwd rows).
    bg_ref  : (1, 8H)   f32  combined gate bias (layout [i|f|o|g] x [fwd|bwd]).
    wdec_ref: (2H, 3*s1) f32 decoder weights rearranged: wdec[d,3j+k]=W[j*2H+d,k].
    msel_ref: (Npad, 3*s1), bsel_ref: (s0, Npad), coll_ref: (3*s1, 3)  0/1 masks
              implementing the (s0, s1*2H) reshape + Linear without in-kernel reshapes.
    bdec_ref: (1, 3)    f32  decoder bias.
    out_ref : (s0, 3)   f32  triplet logits.
    """
    s0, n_pad = bsel_ref.shape
    h2 = wh_ref.shape[0]                 # 2 * hidden
    vocab = emb_ref.shape[0]
    rows = ids_ref.shape[0]              # 2 * T * n_pad
    tn = rows // 2
    T = tn // n_pad

    # ---- embedding lookup (exact one-hot matmul; fuses gather into the kernel)
    ids = ids_ref[...]                                           # (rows, 1) i32
    onehot = (ids == lax.broadcasted_iota(jnp.int32, (rows, vocab), 1)
              ).astype(jnp.float32)                              # (rows, V)
    emb = jnp.dot(onehot, emb_ref[...],
                  preferred_element_type=jnp.float32)            # (rows, D)

    # forward-time rows | reverse-time rows, concatenated along lanes -> (T*Npad, 2D)
    x_cat = jnp.concatenate([emb[:tn, :], emb[tn:, :]], axis=1)

    # ---- hoisted input projection: one big matmul, gate bias folded in
    xp = jnp.dot(x_cat, wx_ref[...],
                 preferred_element_type=jnp.float32) + bg_ref[...]   # (T*Npad, 8H)

    # ---- merged fwd/bwd recurrence, fully unrolled (T is a static Python int)
    wh = wh_ref[...]
    h = jnp.zeros((n_pad, h2), jnp.float32)       # [h_fwd | h_bwd]
    c = jnp.zeros((n_pad, h2), jnp.float32)       # [c_fwd | c_bwd]
    for t in range(T):
        g_all = xp[t * n_pad:(t + 1) * n_pad, :] + jnp.dot(
            h, wh, preferred_element_type=jnp.float32)           # (Npad, 8H)
        sig = jax.nn.sigmoid(g_all[:, :3 * h2])                  # i | f | o blocks
        g_t = jnp.tanh(g_all[:, 3 * h2:])                        # g block
        i_g = sig[:, 0:h2]
        f_g = sig[:, h2:2 * h2]
        o_g = sig[:, 2 * h2:3 * h2]
        c = f_g * c + i_g * g_t
        h = o_g * jnp.tanh(c)
    # h == [fwd final hidden | bwd final hidden]  == torch's cat((out[:,-1,:H], out[:,0,H:]))

    # ---- fused triplet decoder: (s0, s1*2H) @ W_dec expressed as masked matmuls
    z = jnp.dot(h, wdec_ref[...], preferred_element_type=jnp.float32)   # (Npad, 3*s1)
    y = jnp.dot(bsel_ref[...], z * msel_ref[...],
                preferred_element_type=jnp.float32)                     # (s0, 3*s1)
    out_ref[...] = jnp.dot(y, coll_ref[...],
                           preferred_element_type=jnp.float32) + bdec_ref[...]


# --------------------------- parameter repacking -------------------------------

def _interleave_gates(wf, wb):
    """(rows, 4H) torch gate order i,f,g,o -> (rows, 8H) layout
    [i_f i_b | f_f f_b | o_f o_b | g_f g_b]."""
    H = wf.shape[1] // 4
    parts = []
    for tg in (0, 1, 3, 2):          # our gate order: i, f, o, g
        parts.append(wf[:, tg * H:(tg + 1) * H])
        parts.append(wb[:, tg * H:(tg + 1) * H])
    return jnp.concatenate(parts, axis=1)


def pack_params(params, s1):
    """One-time repack of module parameters into the fused-kernel layout."""
    wih_f, wih_b = params["wih_f"], params["wih_b"]      # (D, 4H)
    whh_f, whh_b = params["whh_f"], params["whh_b"]      # (H, 4H)
    b_f, b_b = params["b_f"], params["b_b"]              # (1, 4H)
    w_dec, b_dec = params["w_dec"], params["b_dec"]      # (s1*2H, 3), (1, 3)
    h2 = 2 * whh_f.shape[0]
    zx = jnp.zeros_like(wih_f)
    zh = jnp.zeros_like(whh_f)
    wx = jnp.concatenate([_interleave_gates(wih_f, zx),      # rows for forward-time x
                          _interleave_gates(zx, wih_b)], axis=0)   # rows for reverse-time x
    wh = jnp.concatenate([_interleave_gates(whh_f, zh),      # rows for h_fwd
                          _interleave_gates(zh, whh_b)], axis=0)   # rows for h_bwd
    bg = _interleave_gates(b_f, b_b)                          # (1, 8H)
    # wdec[d, 3*j + k] = w_dec[j*2H + d, k]
    wdec = jnp.transpose(w_dec.reshape(s1, h2, 3), (1, 0, 2)).reshape(h2, s1 * 3)
    return {"emb": params["emb_table"], "wx": wx, "wh": wh, "bg": bg,
            "wdec": wdec, "bdec": b_dec}


# --------------------------------- forward -------------------------------------

def encoder_decoder_triplet(tokens, packed):
    """tokens: int32 (s0, s1, s2) -> (s0, 3) triplet logits."""
    s0, s1, T = tokens.shape
    N = s0 * s1
    n_pad = max(8, -(-N // 8) * 8)            # sublane-align the batch rows

    # TODO(synk): frozen BERT embed_model replaced by a deterministic per-token
    # embedding-table lookup (done inside the kernel via one-hot matmul).
    xv = tokens.reshape(N, T)
    xv = jnp.pad(xv, ((0, n_pad - N), (0, 0)))               # pad rows use token id 0
    ids_fwd = jnp.transpose(xv, (1, 0)).reshape(T * n_pad)
    ids_bwd = jnp.transpose(xv[:, ::-1], (1, 0)).reshape(T * n_pad)
    ids = jnp.concatenate([ids_fwd, ids_bwd]).reshape(2 * T * n_pad, 1).astype(jnp.int32)

    # static 0/1 matrices implementing the (s0, s1*2H) reshape + Linear inside the kernel
    n_idx = np.arange(n_pad)
    c_idx = np.arange(3 * s1)
    msel = jnp.asarray((c_idx[None, :] // 3) == (n_idx[:, None] % s1), jnp.float32)
    bsel = jnp.asarray(((n_idx[None, :] // s1) == np.arange(s0)[:, None])
                       & (n_idx[None, :] < N), jnp.float32)
    coll = jnp.asarray((c_idx[:, None] % 3) == np.arange(3)[None, :], jnp.float32)

    return pl.pallas_call(
        _fused_kernel,
        out_shape=jax.ShapeDtypeStruct((s0, 3), jnp.float32),
        in_specs=[_VMEM] * 10,
        out_specs=_VMEM,
    )(ids, packed["emb"], packed["wx"], packed["wh"], packed["bg"],
      packed["wdec"], msel, bsel, coll, packed["bdec"])


# ----------------------------- pure-JAX reference -------------------------------

def _reference(tokens, params):
    s0, s1, s2 = tokens.shape
    xv = tokens.reshape(s0 * s1, s2)
    embeds = params["emb_table"][xv]                      # (N, T, D)
    N, T, _ = embeds.shape
    H = params["whh_f"].shape[0]

    def run_dir(wih, whh, b, reverse):
        h = jnp.zeros((N, H), jnp.float32)
        c = jnp.zeros((N, H), jnp.float32)
        ts = range(T - 1, -1, -1) if reverse else range(T)
        for t in ts:
            g = embeds[:, t, :] @ wih + h @ whh + b
            i_g = jax.nn.sigmoid(g[:, 0:H])
            f_g = jax.nn.sigmoid(g[:, H:2 * H])
            g_g = jnp.tanh(g[:, 2 * H:3 * H])
            o_g = jax.nn.sigmoid(g[:, 3 * H:4 * H])
            c = f_g * c + i_g * g_g
            h = o_g * jnp.tanh(c)
        return h

    h_fwd = run_dir(params["wih_f"], params["whh_f"], params["b_f"], False)
    h_bwd = run_dir(params["wih_b"], params["whh_b"], params["b_b"], True)
    para_vec = jnp.concatenate([h_fwd, h_bwd], axis=1)
    pvv = para_vec.reshape(s0, -1)
    return pvv @ params["w_dec"] + params["b_dec"]


# ------------------------------------ main ---------------------------------------

if __name__ == "__main__":
    # Small shapes consistent with the module: batch s0=2, context window
    # s1 = 1 + 2*context = 3, seq len s2=8, encoder_input_dim D=64, hidden H=32.
    s0, s1, s2 = 2, 3, 8
    D, H, vocab = 64, 32, 50
    dec_in = 2 * H * s1            # encoder_hidden_size * 2 * (1 + 2*context)

    key = jax.random.PRNGKey(0)
    keys = jax.random.split(key, 8)

    tokens = jax.random.randint(keys[0], (s0, s1, s2), 0, vocab, dtype=jnp.int32)

    params = {
        "emb_table": 0.1 * jax.random.normal(keys[1], (vocab, D), jnp.float32),
        # LSTM weights (torch gate order i,f,g,o); biases zero as in the module init.
        "wih_f": 0.1 * jax.random.normal(keys[2], (D, 4 * H), jnp.float32),
        "whh_f": 0.1 * jax.random.normal(keys[3], (H, 4 * H), jnp.float32),
        "b_f": jnp.zeros((1, 4 * H), jnp.float32),
        "wih_b": 0.1 * jax.random.normal(keys[4], (D, 4 * H), jnp.float32),
        "whh_b": 0.1 * jax.random.normal(keys[5], (H, 4 * H), jnp.float32),
        "b_b": jnp.zeros((1, 4 * H), jnp.float32),
        # Decoder Linear(dec_in -> 3) with bias.
        "w_dec": 0.1 * jax.random.normal(keys[6], (dec_in, 3), jnp.float32),
        "b_dec": 0.1 * jax.random.normal(keys[7], (1, 3), jnp.float32),
    }

    packed = jax.tree.map(jax.block_until_ready, pack_params(params, s1))
    forward = jax.jit(encoder_decoder_triplet)

    out = jax.block_until_ready(forward(tokens, packed))
    ref = jax.block_until_ready(_reference(tokens, params))

    assert out.shape == (s0, 3), out.shape
    np.testing.assert_allclose(np.asarray(out), np.asarray(ref),
                               rtol=1e-3, atol=1e-3)
    print("KERNEL_OK")
</pallas_src>

<mosaic_0001>
module attributes {stable_mosaic.version = 11 : i64} {
  func.func @_fused_kernel(%arg0: memref<128x1xi32, #tpu.memory_space<vmem>>, %arg1: memref<50x64xf32, #tpu.memory_space<vmem>>, %arg2: memref<128x256xf32, #tpu.memory_space<vmem>>, %arg3: memref<64x256xf32, #tpu.memory_space<vmem>>, %arg4: memref<1x256xf32, #tpu.memory_space<vmem>>, %arg5: memref<64x9xf32, #tpu.memory_space<vmem>>, %arg6: memref<8x9xf32, #tpu.memory_space<vmem>>, %arg7: memref<2x8xf32, #tpu.memory_space<vmem>>, %arg8: memref<9x3xf32, #tpu.memory_space<vmem>>, %arg9: memref<1x3xf32, #tpu.memory_space<vmem>>, %arg10: memref<2x3xf32, #tpu.memory_space<vmem>>) attributes {dimension_semantics = [], scalar_prefetch = 0 : i64, scratch_operands = 0 : i64, tpu.core_type = #tpu.core_type<tc>} {
    %c0 = arith.constant 0 : index
    %c0_0 = arith.constant 0 : index
    %0 = vector.load %arg0[%c0, %c0_0] : memref<128x1xi32, #tpu.memory_space<vmem>>, vector<128x1xi32>
    %1 = tpu.iota {dimensions = array<i32: 1>} : vector<128x50xi32>
    %2 = vector.broadcast %0 : vector<128x1xi32> to vector<128x50xi32>
    %3 = arith.cmpi eq, %2, %1 : vector<128x50xi32>
    %4 = arith.extui %3 : vector<128x50xi1> to vector<128x50xi32>
    %5 = arith.sitofp %4 : vector<128x50xi32> to vector<128x50xf32>
    %c0_1 = arith.constant 0 : index
    %c0_2 = arith.constant 0 : index
    %6 = vector.load %arg1[%c0_1, %c0_2] : memref<50x64xf32, #tpu.memory_space<vmem>>, vector<50x64xf32>
    %cst = arith.constant dense<0.000000e+00> : vector<128x64xf32>
    %7 = tpu.matmul %5, %6, %cst {dimension_numbers = #tpu.dot_dimension_numbers<[1], [0], [0], [1], [0, 0, 1, 1], [], []>} : vector<128x50xf32>, vector<50x64xf32>, vector<128x64xf32> -> vector<128x64xf32>
    %8 = vector.extract_strided_slice %7 {offsets = [0, 0], sizes = [64, 64], strides = [1, 1]} : vector<128x64xf32> to vector<64x64xf32>
    %9 = vector.extract_strided_slice %7 {offsets = [64, 0], sizes = [64, 64], strides = [1, 1]} : vector<128x64xf32> to vector<64x64xf32>
    %10 = tpu.concatenate %8, %9 in 1 : vector<64x64xf32>, vector<64x64xf32> -> vector<64x128xf32>
    %c0_3 = arith.constant 0 : index
    %c0_4 = arith.constant 0 : index
    %11 = vector.load %arg2[%c0_3, %c0_4] : memref<128x256xf32, #tpu.memory_space<vmem>>, vector<128x256xf32>
    %cst_5 = arith.constant dense<0.000000e+00> : vector<64x256xf32>
    %12 = tpu.matmul %10, %11, %cst_5 {dimension_numbers = #tpu.dot_dimension_numbers<[1], [0], [0], [1], [0, 0, 1, 1], [], []>} : vector<64x128xf32>, vector<128x256xf32>, vector<64x256xf32> -> vector<64x256xf32>
    %c0_6 = arith.constant 0 : index
    %c0_7 = arith.constant 0 : index
    %13 = vector.load %arg4[%c0_6, %c0_7] : memref<1x256xf32, #tpu.memory_space<vmem>>, vector<1x256xf32>
    %14 = vector.broadcast %13 : vector<1x256xf32> to vector<64x256xf32>
    %15 = arith.addf %12, %14 : vector<64x256xf32>
    %c0_8 = arith.constant 0 : index
    %c0_9 = arith.constant 0 : index
    %16 = vector.load %arg3[%c0_8, %c0_9] : memref<64x256xf32, #tpu.memory_space<vmem>>, vector<64x256xf32>
    %cst_10 = arith.constant 0.000000e+00 : f32
    %17 = vector.broadcast %cst_10 : f32 to vector<8x64xf32>
    %cst_11 = arith.constant 0.000000e+00 : f32
    %18 = vector.broadcast %cst_11 : f32 to vector<8x64xf32>
    %19 = vector.extract_strided_slice %15 {offsets = [0, 0], sizes = [8, 256], strides = [1, 1]} : vector<64x256xf32> to vector<8x256xf32>
    %cst_12 = arith.constant dense<0.000000e+00> : vector<8x256xf32>
    %20 = tpu.matmul %17, %16, %cst_12 {dimension_numbers = #tpu.dot_dimension_numbers<[1], [0], [0], [1], [0, 0, 1, 1], [], []>} : vector<8x64xf32>, vector<64x256xf32>, vector<8x256xf32> -> vector<8x256xf32>
    %21 = arith.addf %19, %20 : vector<8x256xf32>
    %22 = vector.extract_strided_slice %21 {offsets = [0, 0], sizes = [8, 192], strides = [1, 1]} : vector<8x256xf32> to vector<8x192xf32>
    %23 = arith.negf %22 : vector<8x192xf32>
    %24 = math.exp %23 : vector<8x192xf32>
    %cst_13 = arith.constant 1.000000e+00 : f32
    %25 = vector.broadcast %cst_13 : f32 to vector<8x192xf32>
    %26 = arith.addf %25, %24 : vector<8x192xf32>
    %27 = arith.divf %25, %26 : vector<8x192xf32>
    %28 = vector.extract_strided_slice %21 {offsets = [0, 192], sizes = [8, 64], strides = [1, 1]} : vector<8x256xf32> to vector<8x64xf32>
    %29 = math.tanh %28 : vector<8x64xf32>
    %30 = vector.extract_strided_slice %27 {offsets = [0, 0], sizes = [8, 64], strides = [1, 1]} : vector<8x192xf32> to vector<8x64xf32>
    %31 = vector.extract_strided_slice %27 {offsets = [0, 64], sizes = [8, 64], strides = [1, 1]} : vector<8x192xf32> to vector<8x64xf32>
    %32 = vector.extract_strided_slice %27 {offsets = [0, 128], sizes = [8, 64], strides = [1, 1]} : vector<8x192xf32> to vector<8x64xf32>
    %33 = arith.mulf %31, %18 : vector<8x64xf32>
    %34 = arith.mulf %30, %29 : vector<8x64xf32>
    %35 = arith.addf %33, %34 : vector<8x64xf32>
    %36 = math.tanh %35 : vector<8x64xf32>
    %37 = arith.mulf %32, %36 : vector<8x64xf32>
    %38 = vector.extract_strided_slice %15 {offsets = [8, 0], sizes = [8, 256], strides = [1, 1]} : vector<64x256xf32> to vector<8x256xf32>
    %cst_14 = arith.constant dense<0.000000e+00> : vector<8x256xf32>
    %39 = tpu.matmul %37, %16, %cst_14 {dimension_numbers = #tpu.dot_dimension_numbers<[1], [0], [0], [1], [0, 0, 1, 1], [], []>} : vector<8x64xf32>, vector<64x256xf32>, vector<8x256xf32> -> vector<8x256xf32>
    %40 = arith.addf %38, %39 : vector<8x256xf32>
    %41 = vector.extract_strided_slice %40 {offsets = [0, 0], sizes = [8, 192], strides = [1, 1]} : vector<8x256xf32> to vector<8x192xf32>
    %42 = arith.negf %41 : vector<8x192xf32>
    %43 = math.exp %42 : vector<8x192xf32>
    %cst_15 = arith.constant 1.000000e+00 : f32
    %44 = vector.broadcast %cst_15 : f32 to vector<8x192xf32>
    %45 = arith.addf %44, %43 : vector<8x192xf32>
    %46 = arith.divf %44, %45 : vector<8x192xf32>
    %47 = vector.extract_strided_slice %40 {offsets = [0, 192], sizes = [8, 64], strides = [1, 1]} : vector<8x256xf32> to vector<8x64xf32>
    %48 = math.tanh %47 : vector<8x64xf32>
    %49 = vector.extract_strided_slice %46 {offsets = [0, 0], sizes = [8, 64], strides = [1, 1]} : vector<8x192xf32> to vector<8x64xf32>
    %50 = vector.extract_strided_slice %46 {offsets = [0, 64], sizes = [8, 64], strides = [1, 1]} : vector<8x192xf32> to vector<8x64xf32>
    %51 = vector.extract_strided_slice %46 {offsets = [0, 128], sizes = [8, 64], strides = [1, 1]} : vector<8x192xf32> to vector<8x64xf32>
    %52 = arith.mulf %50, %35 : vector<8x64xf32>
    %53 = arith.mulf %49, %48 : vector<8x64xf32>
    %54 = arith.addf %52, %53 : vector<8x64xf32>
    %55 = math.tanh %54 : vector<8x64xf32>
    %56 = arith.mulf %51, %55 : vector<8x64xf32>
    %57 = vector.extract_strided_slice %15 {offsets = [16, 0], sizes = [8, 256], strides = [1, 1]} : vector<64x256xf32> to vector<8x256xf32>
    %cst_16 = arith.constant dense<0.000000e+00> : vector<8x256xf32>
    %58 = tpu.matmul %56, %16, %cst_16 {dimension_numbers = #tpu.dot_dimension_numbers<[1], [0], [0], [1], [0, 0, 1, 1], [], []>} : vector<8x64xf32>, vector<64x256xf32>, vector<8x256xf32> -> vector<8x256xf32>
    %59 = arith.addf %57, %58 : vector<8x256xf32>
    %60 = vector.extract_strided_slice %59 {offsets = [0, 0], sizes = [8, 192], strides = [1, 1]} : vector<8x256xf32> to vector<8x192xf32>
    %61 = arith.negf %60 : vector<8x192xf32>
    %62 = math.exp %61 : vector<8x192xf32>
    %cst_17 = arith.constant 1.000000e+00 : f32
    %63 = vector.broadcast %cst_17 : f32 to vector<8x192xf32>
    %64 = arith.addf %63, %62 : vector<8x192xf32>
    %65 = arith.divf %63, %64 : vector<8x192xf32>
    %66 = vector.extract_strided_slice %59 {offsets = [0, 192], sizes = [8, 64], strides = [1, 1]} : vector<8x256xf32> to vector<8x64xf32>
    %67 = math.tanh %66 : vector<8x64xf32>
    %68 = vector.extract_strided_slice %65 {offsets = [0, 0], sizes = [8, 64], strides = [1, 1]} : vector<8x192xf32> to vector<8x64xf32>
    %69 = vector.extract_strided_slice %65 {offsets = [0, 64], sizes = [8, 64], strides = [1, 1]} : vector<8x192xf32> to vector<8x64xf32>
    %70 = vector.extract_strided_slice %65 {offsets = [0, 128], sizes = [8, 64], strides = [1, 1]} : vector<8x192xf32> to vector<8x64xf32>
    %71 = arith.mulf %69, %54 : vector<8x64xf32>
    %72 = arith.mulf %68, %67 : vector<8x64xf32>
    %73 = arith.addf %71, %72 : vector<8x64xf32>
    %74 = math.tanh %73 : vector<8x64xf32>
    %75 = arith.mulf %70, %74 : vector<8x64xf32>
    %76 = vector.extract_strided_slice %15 {offsets = [24, 0], sizes = [8, 256], strides = [1, 1]} : vector<64x256xf32> to vector<8x256xf32>
    %cst_18 = arith.constant dense<0.000000e+00> : vector<8x256xf32>
    %77 = tpu.matmul %75, %16, %cst_18 {dimension_numbers = #tpu.dot_dimension_numbers<[1], [0], [0], [1], [0, 0, 1, 1], [], []>} : vector<8x64xf32>, vector<64x256xf32>, vector<8x256xf32> -> vector<8x256xf32>
    %78 = arith.addf %76, %77 : vector<8x256xf32>
    %79 = vector.extract_strided_slice %78 {offsets = [0, 0], sizes = [8, 192], strides = [1, 1]} : vector<8x256xf32> to vector<8x192xf32>
    %80 = arith.negf %79 : vector<8x192xf32>
    %81 = math.exp %80 : vector<8x192xf32>
    %cst_19 = arith.constant 1.000000e+00 : f32
    %82 = vector.broadcast %cst_19 : f32 to vector<8x192xf32>
    %83 = arith.addf %82, %81 : vector<8x192xf32>
    %84 = arith.divf %82, %83 : vector<8x192xf32>
    %85 = vector.extract_strided_slice %78 {offsets = [0, 192], sizes = [8, 64], strides = [1, 1]} : vector<8x256xf32> to vector<8x64xf32>
    %86 = math.tanh %85 : vector<8x64xf32>
    %87 = vector.extract_strided_slice %84 {offsets = [0, 0], sizes = [8, 64], strides = [1, 1]} : vector<8x192xf32> to vector<8x64xf32>
    %88 = vector.extract_strided_slice %84 {offsets = [0, 64], sizes = [8, 64], strides = [1, 1]} : vector<8x192xf32> to vector<8x64xf32>
    %89 = vector.extract_strided_slice %84 {offsets = [0, 128], sizes = [8, 64], strides = [1, 1]} : vector<8x192xf32> to vector<8x64xf32>
    %90 = arith.mulf %88, %73 : vector<8x64xf32>
    %91 = arith.mulf %87, %86 : vector<8x64xf32>
    %92 = arith.addf %90, %91 : vector<8x64xf32>
    %93 = math.tanh %92 : vector<8x64xf32>
    %94 = arith.mulf %89, %93 : vector<8x64xf32>
    %95 = vector.extract_strided_slice %15 {offsets = [32, 0], sizes = [8, 256], strides = [1, 1]} : vector<64x256xf32> to vector<8x256xf32>
    %cst_20 = arith.constant dense<0.000000e+00> : vector<8x256xf32>
    %96 = tpu.matmul %94, %16, %cst_20 {dimension_numbers = #tpu.dot_dimension_numbers<[1], [0], [0], [1], [0, 0, 1, 1], [], []>} : vector<8x64xf32>, vector<64x256xf32>, vector<8x256xf32> -> vector<8x256xf32>
    %97 = arith.addf %95, %96 : vector<8x256xf32>
    %98 = vector.extract_strided_slice %97 {offsets = [0, 0], sizes = [8, 192], strides = [1, 1]} : vector<8x256xf32> to vector<8x192xf32>
    %99 = arith.negf %98 : vector<8x192xf32>
    %100 = math.exp %99 : vector<8x192xf32>
    %cst_21 = arith.constant 1.000000e+00 : f32
    %101 = vector.broadcast %cst_21 : f32 to vector<8x192xf32>
    %102 = arith.addf %101, %100 : vector<8x192xf32>
    %103 = arith.divf %101, %102 : vector<8x192xf32>
    %104 = vector.extract_strided_slice %97 {offsets = [0, 192], sizes = [8, 64], strides = [1, 1]} : vector<8x256xf32> to vector<8x64xf32>
    %105 = math.tanh %104 : vector<8x64xf32>
    %106 = vector.extract_strided_slice %103 {offsets = [0, 0], sizes = [8, 64], strides = [1, 1]} : vector<8x192xf32> to vector<8x64xf32>
    %107 = vector.extract_strided_slice %103 {offsets = [0, 64], sizes = [8, 64], strides = [1, 1]} : vector<8x192xf32> to vector<8x64xf32>
    %108 = vector.extract_strided_slice %103 {offsets = [0, 128], sizes = [8, 64], strides = [1, 1]} : vector<8x192xf32> to vector<8x64xf32>
    %109 = arith.mulf %107, %92 : vector<8x64xf32>
    %110 = arith.mulf %106, %105 : vector<8x64xf32>
    %111 = arith.addf %109, %110 : vector<8x64xf32>
    %112 = math.tanh %111 : vector<8x64xf32>
    %113 = arith.mulf %108, %112 : vector<8x64xf32>
    %114 = vector.extract_strided_slice %15 {offsets = [40, 0], sizes = [8, 256], strides = [1, 1]} : vector<64x256xf32> to vector<8x256xf32>
    %cst_22 = arith.constant dense<0.000000e+00> : vector<8x256xf32>
    %115 = tpu.matmul %113, %16, %cst_22 {dimension_numbers = #tpu.dot_dimension_numbers<[1], [0], [0], [1], [0, 0, 1, 1], [], []>} : vector<8x64xf32>, vector<64x256xf32>, vector<8x256xf32> -> vector<8x256xf32>
    %116 = arith.addf %114, %115 : vector<8x256xf32>
    %117 = vector.extract_strided_slice %116 {offsets = [0, 0], sizes = [8, 192], strides = [1, 1]} : vector<8x256xf32> to vector<8x192xf32>
    %118 = arith.negf %117 : vector<8x192xf32>
    %119 = math.exp %118 : vector<8x192xf32>
    %cst_23 = arith.constant 1.000000e+00 : f32
    %120 = vector.broadcast %cst_23 : f32 to vector<8x192xf32>
    %121 = arith.addf %120, %119 : vector<8x192xf32>
    %122 = arith.divf %120, %121 : vector<8x192xf32>
    %123 = vector.extract_strided_slice %116 {offsets = [0, 192], sizes = [8, 64], strides = [1, 1]} : vector<8x256xf32> to vector<8x64xf32>
    %124 = math.tanh %123 : vector<8x64xf32>
    %125 = vector.extract_strided_slice %122 {offsets = [0, 0], sizes = [8, 64], strides = [1, 1]} : vector<8x192xf32> to vector<8x64xf32>
    %126 = vector.extract_strided_slice %122 {offsets = [0, 64], sizes = [8, 64], strides = [1, 1]} : vector<8x192xf32> to vector<8x64xf32>
    %127 = vector.extract_strided_slice %122 {offsets = [0, 128], sizes = [8, 64], strides = [1, 1]} : vector<8x192xf32> to vector<8x64xf32>
    %128 = arith.mulf %126, %111 : vector<8x64xf32>
    %129 = arith.mulf %125, %124 : vector<8x64xf32>
    %130 = arith.addf %128, %129 : vector<8x64xf32>
    %131 = math.tanh %130 : vector<8x64xf32>
    %132 = arith.mulf %127, %131 : vector<8x64xf32>
    %133 = vector.extract_strided_slice %15 {offsets = [48, 0], sizes = [8, 256], strides = [1, 1]} : vector<64x256xf32> to vector<8x256xf32>
    %cst_24 = arith.constant dense<0.000000e+00> : vector<8x256xf32>
    %134 = tpu.matmul %132, %16, %cst_24 {dimension_numbers = #tpu.dot_dimension_numbers<[1], [0], [0], [1], [0, 0, 1, 1], [], []>} : vector<8x64xf32>, vector<64x256xf32>, vector<8x256xf32> -> vector<8x256xf32>
    %135 = arith.addf %133, %134 : vector<8x256xf32>
    %136 = vector.extract_strided_slice %135 {offsets = [0, 0], sizes = [8, 192], strides = [1, 1]} : vector<8x256xf32> to vector<8x192xf32>
    %137 = arith.negf %136 : vector<8x192xf32>
    %138 = math.exp %137 : vector<8x192xf32>
    %cst_25 = arith.constant 1.000000e+00 : f32
    %139 = vector.broadcast %cst_25 : f32 to vector<8x192xf32>
    %140 = arith.addf %139, %138 : vector<8x192xf32>
    %141 = arith.divf %139, %140 : vector<8x192xf32>
    %142 = vector.extract_strided_slice %135 {offsets = [0, 192], sizes = [8, 64], strides = [1, 1]} : vector<8x256xf32> to vector<8x64xf32>
    %143 = math.tanh %142 : vector<8x64xf32>
    %144 = vector.extract_strided_slice %141 {offsets = [0, 0], sizes = [8, 64], strides = [1, 1]} : vector<8x192xf32> to vector<8x64xf32>
    %145 = vector.extract_strided_slice %141 {offsets = [0, 64], sizes = [8, 64], strides = [1, 1]} : vector<8x192xf32> to vector<8x64xf32>
    %146 = vector.extract_strided_slice %141 {offsets = [0, 128], sizes = [8, 64], strides = [1, 1]} : vector<8x192xf32> to vector<8x64xf32>
    %147 = arith.mulf %145, %130 : vector<8x64xf32>
    %148 = arith.mulf %144, %143 : vector<8x64xf32>
    %149 = arith.addf %147, %148 : vector<8x64xf32>
    %150 = math.tanh %149 : vector<8x64xf32>
    %151 = arith.mulf %146, %150 : vector<8x64xf32>
    %152 = vector.extract_strided_slice %15 {offsets = [56, 0], sizes = [8, 256], strides = [1, 1]} : vector<64x256xf32> to vector<8x256xf32>
    %cst_26 = arith.constant dense<0.000000e+00> : vector<8x256xf32>
    %153 = tpu.matmul %151, %16, %cst_26 {dimension_numbers = #tpu.dot_dimension_numbers<[1], [0], [0], [1], [0, 0, 1, 1], [], []>} : vector<8x64xf32>, vector<64x256xf32>, vector<8x256xf32> -> vector<8x256xf32>
    %154 = arith.addf %152, %153 : vector<8x256xf32>
    %155 = vector.extract_strided_slice %154 {offsets = [0, 0], sizes = [8, 192], strides = [1, 1]} : vector<8x256xf32> to vector<8x192xf32>
    %156 = arith.negf %155 : vector<8x192xf32>
    %157 = math.exp %156 : vector<8x192xf32>
    %cst_27 = arith.constant 1.000000e+00 : f32
    %158 = vector.broadcast %cst_27 : f32 to vector<8x192xf32>
    %159 = arith.addf %158, %157 : vector<8x192xf32>
    %160 = arith.divf %158, %159 : vector<8x192xf32>
    %161 = vector.extract_strided_slice %154 {offsets = [0, 192], sizes = [8, 64], strides = [1, 1]} : vector<8x256xf32> to vector<8x64xf32>
    %162 = math.tanh %161 : vector<8x64xf32>
    %163 = vector.extract_strided_slice %160 {offsets = [0, 0], sizes = [8, 64], strides = [1, 1]} : vector<8x192xf32> to vector<8x64xf32>
    %164 = vector.extract_strided_slice %160 {offsets = [0, 64], sizes = [8, 64], strides = [1, 1]} : vector<8x192xf32> to vector<8x64xf32>
    %165 = vector.extract_strided_slice %160 {offsets = [0, 128], sizes = [8, 64], strides = [1, 1]} : vector<8x192xf32> to vector<8x64xf32>
    %166 = arith.mulf %164, %149 : vector<8x64xf32>
    %167 = arith.mulf %163, %162 : vector<8x64xf32>
    %168 = arith.addf %166, %167 : vector<8x64xf32>
    %169 = math.tanh %168 : vector<8x64xf32>
    %170 = arith.mulf %165, %169 : vector<8x64xf32>
    %c0_28 = arith.constant 0 : index
    %c0_29 = arith.constant 0 : index
    %171 = vector.load %arg5[%c0_28, %c0_29] : memref<64x9xf32, #tpu.memory_space<vmem>>, vector<64x9xf32>
    %cst_30 = arith.constant dense<0.000000e+00> : vector<8x9xf32>
    %172 = tpu.matmul %170, %171, %cst_30 {dimension_numbers = #tpu.dot_dimension_numbers<[1], [0], [0], [1], [0, 0, 1, 1], [], []>} : vector<8x64xf32>, vector<64x9xf32>, vector<8x9xf32> -> vector<8x9xf32>
    %c0_31 = arith.constant 0 : index
    %c0_32 = arith.constant 0 : index
    %173 = vector.load %arg7[%c0_31, %c0_32] : memref<2x8xf32, #tpu.memory_space<vmem>>, vector<2x8xf32>
    %c0_33 = arith.constant 0 : index
    %c0_34 = arith.constant 0 : index
    %174 = vector.load %arg6[%c0_33, %c0_34] : memref<8x9xf32, #tpu.memory_space<vmem>>, vector<8x9xf32>
    %175 = arith.mulf %172, %174 : vector<8x9xf32>
    %cst_35 = arith.constant dense<0.000000e+00> : vector<2x9xf32>
    %176 = tpu.matmul %173, %175, %cst_35 {dimension_numbers = #tpu.dot_dimension_numbers<[1], [0], [0], [1], [0, 0, 1, 1], [], []>} : vector<2x8xf32>, vector<8x9xf32>, vector<2x9xf32> -> vector<2x9xf32>
    %c0_36 = arith.constant 0 : index
    %c0_37 = arith.constant 0 : index
    %177 = vector.load %arg8[%c0_36, %c0_37] : memref<9x3xf32, #tpu.memory_space<vmem>>, vector<9x3xf32>
    %cst_38 = arith.constant dense<0.000000e+00> : vector<2x3xf32>
    %178 = tpu.matmul %176, %177, %cst_38 {dimension_numbers = #tpu.dot_dimension_numbers<[1], [0], [0], [1], [0, 0, 1, 1], [], []>} : vector<2x9xf32>, vector<9x3xf32>, vector<2x3xf32> -> vector<2x3xf32>
    %c0_39 = arith.constant 0 : index
    %c0_40 = arith.constant 0 : index
    %179 = vector.load %arg9[%c0_39, %c0_40] : memref<1x3xf32, #tpu.memory_space<vmem>>, vector<1x3xf32>
    %180 = vector.broadcast %179 : vector<1x3xf32> to vector<2x3xf32>
    %181 = arith.addf %178, %180 : vector<2x3xf32>
    %c0_41 = arith.constant 0 : index
    %c0_42 = arith.constant 0 : index
    %182 = vector.load %arg10[%c0_41, %c0_42] : memref<2x3xf32, #tpu.memory_space<vmem>>, vector<2x3xf32>
    tpu.vector_store %arg10[%c0_41, %c0_42], %181 {strides = array<i32>} : memref<2x3xf32, #tpu.memory_space<vmem>>, vector<2x3xf32>,
    return
  }
}

</mosaic_0001>

<bundles_post_ra>
// kernel: encoder_decoder_triplet.1
= control target key start
LH: loop header
LB: loop body
LE: loop exit
PB: predicated region body
PF: predicated region fallthrough
CT: control target
= control target key end

     0   :  { %15 = vsyncpa [#allocation3], 0  ;;  %s2202_s0 = inlined_call_operand.vmem [shape: s32[128,1], index: 0, kind: input, shape index: {}]   ;;  %s2203_s1 = inlined_call_operand.vmem [shape: f32[50,64], index: 1, kind: input, shape index: {}]   ;;  %s2204_s2 = inlined_call_operand.hbm [shape: f32[128,256], index: 2, kind: input, shape index: {}]   ;;  %s2205_s3 = inlined_call_operand.vmem [shape: f32[64,256], index: 3, kind: input, shape index: {}]   ;;  %s2206_s4 = inlined_call_operand.vmem [shape: f32[1,256], index: 4, kind: input, shape index: {}]   ;;  %s2207_s5 = inlined_call_operand.vmem [shape: f32[64,9], index: 5, kind: input, shape index: {}]   ;;  %s2208_s6 = inlined_call_operand.vmem [shape: f32[8,9], index: 6, kind: input, shape index: {}]   ;;  %s2209_s7 = inlined_call_operand.vmem [shape: f32[2,8], index: 7, kind: input, shape index: {}]   ;;  %s2210_s8 = inlined_call_operand.vmem [shape: f32[9,3], index: 8, kind: input, shape index: {}]   ;;  %s2211_s9 = inlined_call_operand.vmem [shape: f32[1,3], index: 9, kind: input, shape index: {}]   ;;  %s2212_s10 = inlined_call_operand.hbm [shape: f32[2,3], index: 10, kind: output, shape index: {}]  }
   0x1   :  { %16 = vsyncpa [#allocation4], 0  ;;  %s25_s15 = sshll.u32 %s2204_s2, 4  ;;  %s1613_s16 = smov [#allocation2]   ;;  %s26_s15 = int_to_ptr.hbm [resolvable:$true] %s25_s15 }
   0x2   :  { %s27_s17 = sshll.u32 %s1613_s16, 4  ;;  %s1614_s18 = smov 256   ;;  %s28_s17 = int_to_ptr.vmem [resolvable:$true] %s27_s17 }
   0x3   :  { %s1615_s19 = smov 16  }
   0x4   :  { %33 = dma.hbm_to_vmem [thread:$0]  %s26_s15, 4096, %s28_s17, [#allocation3], %s1614_s18, %s1614_s18, %s1615_s19  }
   0x5   :  { %1609 = dma.done.wait [#allocation3], 4096  }
   0x6   :  { %1610 = vsyncadd [#allocation3], 4294963200  ;;  %v1616_v0 = vmov 0   ;;  %v54_v1 = vld [vmem:[%s2202_s0 + $0x10] sm:$0xff]  ;;  %v52_v2 = vld [vmem:[%s2202_s0] sm:$0xff]  ;;  %vm222_vm0 = vcmask 1041408   ;;  %v68_v18 = vlaneseq }
   0x7   :  { %1462 = vset.pattern.permute.xlu1 %v1616_v0  ;;  %1461 = vset.pattern.permute.xlu0 %v1616_v0  ;;  %v56_v3 = vld [vmem:[%s2202_s0 + $0x20] sm:$0xff]  ;;  %v172_v4 = vld [vmem:[%s2203_s1 + $0x30] sm:$0x3]  ;;  %v171_v5 = vld [vmem:[%s2203_s1 + $0x28] sm:$0xff]  ;;  %vm173_vm1 = vcmask 408576   ;;  %v1617_v21 = vmov 0.0  }
   0x8   :  { %1463 = vset.pattern.permute.xlu2 %v1616_v0  ;;  %77 = vperm.xlu1 %1462, %v54_v1   ;;  %v170_v6 = vld [vmem:[%s2203_s1 + $0x20] sm:$0xff]  ;;  %v55_v7 = vld [vmem:[%s2202_s0 + $0x18] sm:$0xff]  ;;  %v53_v8 = vld [vmem:[%s2202_s0 + $0x8] sm:$0xff]  ;;  %v1729_v19 = vand.u32 127, %v68_v18  ;;  %s1618_s15 = smov 64   ;;  %vm323_vm12 = vcmask 523264  }
   0x9   :  { %71 = vperm.xlu0 %1461, %v52_v2   ;;  %83 = vperm.xlu2 %1463, %v56_v3   ;;  %v169_v9 = vld [vmem:[%s2203_s1 + $0x18] sm:$0xff]  ;;  %v57_v10 = vld [vmem:[%s2202_s0 + $0x28] sm:$0xff]  ;;  %v168_v11 = vld [vmem:[%s2203_s1 + $0x10] sm:$0xff]  ;;  %s1377_s13 = sshll.u32 %s2212_s10, 4  ;;  %s1378_s13 = int_to_ptr.hbm [resolvable:$true] %s1377_s13 }
   0xa   :  { %1403 = vmatpush.msk.msra.mxu0 %vm222_vm0, %v172_v4  ;;  %v167_v12 = vld [vmem:[%s2203_s1 + $0x8] sm:$0xff]  ;;  %v59_v13 = vld [vmem:[%s2202_s0 + $0x38] sm:$0xff]  ;;  %v58_v14 = vld [vmem:[%s2202_s0 + $0x30] sm:$0xff] }
   0xb   :  { %v60_v15 = vld [vmem:[%s2202_s0 + $0x40] sm:$0xff]  ;;  %v61_v16 = vld [vmem:[%s2202_s0 + $0x48] sm:$0xff]  ;;  %v362_v47 = vld [vmem:[#allocation2 + $0xf0] sm:$0xff] }
   0xc   :  { %236 = vmatpush.msra.mxu0 %v171_v5  ;;  %v166_v17 = vld [vmem:[%s2203_s1] sm:$0xff]  ;;  %v363_v48 = vld [vmem:[#allocation2 + $0xf8] sm:$0xff]  ;;  %370 = vmatpush.msra.mxu1 %v362_v47  ;;  %v361_v50 = vld [vmem:[#allocation2 + $0xe8] sm:$0xff] }
   0xd   :  { %v360_v49 = vld [vmem:[#allocation2 + $0xe0] sm:$0xff]  ;;  %411 = vmatpush.msra.mxu2 %v363_v48  ;;  %v1776_v51 = vld [vmem:[%s2205_s3 + $0x70] sm:$0xff]  ;;  %v359_v53 = vld [vmem:[#allocation2 + $0xd8] sm:$0xff] }
   0xe   :  { %237 = vmatpush.msra.mxu0 %v170_v6  ;;  %479 = vmatpush.msra.mxu3 %v1776_v51  ;;  %v358_v52 = vld [vmem:[#allocation2 + $0xd0] sm:$0xff]  ;;  %v1782_v54 = vld [vmem:[%s2205_s3 + $0x60] sm:$0xff]  ;;  %v357_v57 = vld [vmem:[#allocation2 + $0xc8] sm:$0xff] }
   0xf   :  { %371 = vmatpush.msra.mxu1 %v360_v49  ;;  %412 = vmatpush.msra.mxu2 %v361_v50  ;;  %v1788_v55 = vld [vmem:[%s2205_s3 + $0x50] sm:$0xff]  ;;  %v356_v56 = vld [vmem:[#allocation2 + $0xc0] sm:$0xff]  ;;  %v355_v60 = vld [vmem:[#allocation2 + $0xb8] sm:$0xff] }
  0x10   :  { %80 = vperm.xlu1 %1462, %v55_v7   ;;  %238 = vmatpush.msra.mxu0 %v169_v9  ;;  %v1795_v58 = vld [vmem:[%s2205_s3 + $0x40] sm:$0xff]  ;;  %v354_v59 = vld [vmem:[#allocation2 + $0xb0] sm:$0xff]  ;;  %v353_v0 = vld [vmem:[#allocation2 + $0xa8] sm:$0xff] }
  0x11   :  { %74 = vperm.xlu0 %1461, %v53_v8   ;;  %86 = vperm.xlu2 %1463, %v57_v10   ;;  %v1802_v61 = vld [vmem:[%s2205_s3 + $0x30] sm:$0xff]  ;;  %v352_v63 = vld [vmem:[#allocation2 + $0xa0] sm:$0xff]  ;;  %v351_v3 = vld [vmem:[#allocation2 + $0x98] sm:$0xff] }
  0x12   :  { %239 = vmatpush.msra.mxu0 %v168_v11  ;;  %480 = vmatpush.msra.mxu3 %v1782_v54  ;;  %v1811_v1 = vld [vmem:[%s2205_s3 + $0x20] sm:$0xff]  ;;  %v350_v2 = vld [vmem:[#allocation2 + $0x90] sm:$0xff]  ;;  %v349_v6 = vld [vmem:[#allocation2 + $0x88] sm:$0xff] }
  0x13   :  { %372 = vmatpush.msra.mxu1 %v358_v52  ;;  %413 = vmatpush.msra.mxu2 %v359_v53  ;;  %v1818_v4 = vld [vmem:[%s2205_s3 + $0x10] sm:$0xff]  ;;  %v348_v5 = vld [vmem:[#allocation2 + $0x80] sm:$0xff]  ;;  %v347_v9 = vld [vmem:[#allocation2 + $0x78] sm:$0xff] }
  0x14   :  { %240 = vmatpush.msra.mxu0 %v167_v12  ;;  %481 = vmatpush.msra.mxu3 %v1788_v55  ;;  %v1825_v7 = vld [vmem:[%s2205_s3] sm:$0xff]  ;;  %v346_v8 = vld [vmem:[#allocation2 + $0x70] sm:$0xff]  ;;  %v1832_v10 = vld [vmem:[%s2205_s3 + $0x78] sm:$0xff] }
  0x15   :  { %373 = vmatpush.msra.mxu1 %v356_v56  ;;  %414 = vmatpush.msra.mxu2 %v357_v57  ;;  %v344_v12 = vld [vmem:[#allocation2 + $0x60] sm:$0xff]  ;;  %v67_v56 = vld [vmem:[%s2202_s0 + $0x78] sm:$0xff] }
  0x16   :  { %241 = vmatpush.msra.mxu0 %v166_v17  ;;  %482 = vmatpush.msra.mxu3 %v1795_v58  ;;  %v1847_v17 = vld [vmem:[%s2205_s3 + $0x58] sm:$0xff]  ;;  %v340_v18 = vld [vmem:[#allocation2 + $0x40] sm:$0xff] }
  0x17   :  { %374 = vmatpush.msra.mxu1 %v354_v59  ;;  %415 = vmatpush.msra.mxu2 %v355_v60  ;;  %v64_v53 = vld [vmem:[%s2202_s0 + $0x60] sm:$0xff] }
  0x18   :  { %92 = vperm.xlu1 %1462, %v59_v13   ;;  %1186 = vmatpush.msrb.mxu0 %v1776_v51  ;;  %v345_v13 = vld [vmem:[#allocation2 + $0x68] sm:$0xff] }
  0x19   :  { %89 = vperm.xlu0 %1461, %v58_v14   ;;  %95 = vperm.xlu2 %1463, %v60_v15   ;;  %v1841_v14 = vld [vmem:[%s2205_s3 + $0x68] sm:$0xff]  ;;  %v342_v15 = vld [vmem:[#allocation2 + $0x50] sm:$0xff] }
  0x1a   :  { %1187 = vmatpush.msrb.mxu0 %v1782_v54  ;;  %483 = vmatpush.msra.mxu3 %v1802_v61 }
  0x1b   :  { %375 = vmatpush.msra.mxu1 %v352_v63  ;;  %416 = vmatpush.msra.mxu2 %v353_v0 }
  0x1c   :  { %1188 = vmatpush.msrb.mxu0 %v1788_v55  ;;  %484 = vmatpush.msra.mxu3 %v1811_v1 }
  0x1d   :  { %376 = vmatpush.msra.mxu1 %v350_v2  ;;  %417 = vmatpush.msra.mxu2 %v351_v3 }
  0x1e   :  { %1189 = vmatpush.msrb.mxu0 %v1795_v58  ;;  %485 = vmatpush.msra.mxu3 %v1818_v4 }
  0x1f   :  { %377 = vmatpush.msra.mxu1 %v348_v5  ;;  %418 = vmatpush.msra.mxu2 %v349_v6 }
  0x20   :  { %98 = vperm.xlu1 %1462, %v61_v16   ;;  %1190 = vmatpush.msrb.mxu0 %v1802_v61  ;;  %v343_v16 = vld [vmem:[#allocation2 + $0x58] sm:$0xff] }
  0x21   :  { %486 = vmatpush.msra.mxu3 %v1825_v7  ;;  %378 = vmatpush.msra.mxu1 %v346_v8 }
  0x22   :  { %1191 = vmatpush.msrb.mxu0 %v1811_v1  ;;  %419 = vmatpush.msra.mxu2 %v347_v9 }
  0x23   :  { %499 = vmatpush.msrb.mxu3 %v1832_v10  ;;  %379 = vmatpush.msra.mxu1 %v344_v12 }
  0x24   :  { %1192 = vmatpush.msrb.mxu0 %v1818_v4  ;;  %420 = vmatpush.msra.mxu2 %v345_v13 }
  0x25   :  { %500 = vmatpush.msrb.mxu3 %v1841_v14  ;;  %380 = vmatpush.msra.mxu1 %v342_v15 }
  0x26   :  { %1193 = vmatpush.msrb.mxu0 %v1825_v7  ;;  %421 = vmatpush.msra.mxu2 %v343_v16 }
  0x27   :  { %501 = vmatpush.msrb.mxu3 %v1847_v17  ;;  %381 = vmatpush.msra.mxu1 %v340_v18 }
  0x28   :  { %487 = vmatmul.f32.vlgmr.msra.gmra.mxu3 %v1617_v21 }
  0x63   :  { %v84_v29 = vpop.permute.xlu2 %83 }
  0x64   :  { %vm122_vm6 = vcmp.eq.s32.totalorder %v84_v29, %v1729_v19  ;;  %v334_v29 = vld [vmem:[#allocation2 + $0x10] sm:$0xff] }
  0x65   :  { %v1391_v30 = vsel %vm122_vm6, 1.0, %v1617_v21 }
  0x6b   :  { %v87_v31 = vpop.permute.xlu2 %86 }
  0x6c   :  { %vm123_vm7 = vcmp.eq.s32.totalorder %v87_v31, %v1729_v19  ;;  %v335_v31 = vld [vmem:[#allocation2 + $0x18] sm:$0xff] }
  0x6d   :  { %v1392_v32 = vsel %vm123_vm7, 1.0, %v1617_v21 }
  0x73   :  { %v96_v37 = vpop.permute.xlu2 %95 }
  0x74   :  { %vm126_vm10 = vcmp.eq.s32.totalorder %v96_v37, %v1729_v19 }
  0x75   :  { %v1395_v38 = vsel %vm126_vm10, 1.0, %v1617_v21 }
  0x7a   :  { %v78_v25 = vpop.permute.xlu1 %77 }
  0x7b   :  { %v72_v20 = vpop.permute.xlu0 %71  ;;  %vm120_vm4 = vcmp.eq.s32.totalorder %v78_v25, %v1729_v19 }
  0x7c   :  { %vm118_vm2 = vcmp.eq.s32.totalorder %v72_v20, %v1729_v19  ;;  %v1389_v26 = vsel %vm120_vm4, 1.0, %v1617_v21  ;;  %v341_v20 = vld [vmem:[#allocation2 + $0x48] sm:$0xff] }
  0x7d   :  { %v1387_v22 = vsel %vm118_vm2, 1.0, %v1617_v21  ;;  %422 = vmatpush.msra.mxu2 %v341_v20 }
  0x7e   :  { %1404 = vmatmul.msk.f32.vlgmr.msra.gmra.mxu0 %vm173_vm1, %v1387_v22  ;;  %v1853_v22 = vld [vmem:[%s2205_s3 + $0x48] sm:$0xff] }
  0x7f   :  { %502 = vmatpush.msrb.mxu3 %v1853_v22 }
  0x82   :  { %v81_v27 = vpop.permute.xlu1 %80 }
  0x83   :  { %v75_v23 = vpop.permute.xlu0 %74  ;;  %vm121_vm5 = vcmp.eq.s32.totalorder %v81_v27, %v1729_v19  ;;  %v1860_v27 = vld [vmem:[%s2205_s3 + $0x38] sm:$0xff] }
  0x84   :  { %vm119_vm3 = vcmp.eq.s32.totalorder %v75_v23, %v1729_v19  ;;  %v1390_v28 = vsel %vm121_vm5, 1.0, %v1617_v21  ;;  %v338_v23 = vld [vmem:[#allocation2 + $0x30] sm:$0xff]  ;;  %503 = vmatpush.msrb.mxu3 %v1860_v27 }
  0x85   :  { %v1388_v24 = vsel %vm119_vm3, 1.0, %v1617_v21  ;;  %382 = vmatpush.msra.mxu1 %v338_v23 }
  0x86   :  { %1405 = vmatmul.msk.f32.gmra.mxu0 %vm173_vm1, %v1388_v24  ;;  %v339_v24 = vld [vmem:[#allocation2 + $0x38] sm:$0xff] }
  0x87   :  { %423 = vmatpush.msra.mxu2 %v339_v24 }
  0x8a   :  { %v93_v35 = vpop.permute.xlu1 %92 }
  0x8b   :  { %v90_v33 = vpop.permute.xlu0 %89  ;;  %vm125_vm9 = vcmp.eq.s32.totalorder %v93_v35, %v1729_v19  ;;  %v1880_v35 = vld [vmem:[%s2205_s3 + $0x8] sm:$0xff] }
  0x8c   :  { %vm124_vm8 = vcmp.eq.s32.totalorder %v90_v33, %v1729_v19  ;;  %v1394_v36 = vsel %vm125_vm9, 1.0, %v1617_v21  ;;  %v333_v33 = vld [vmem:[#allocation2 + $0x8] sm:$0xff] }
  0x8d   :  { %v1393_v34 = vsel %vm124_vm8, 1.0, %v1617_v21 }
  0x8e   :  { %1406 = vmatmul.msk.f32.gmra.mxu0 %vm173_vm1, %v1389_v26  ;;  %v336_v26 = vld [vmem:[#allocation2 + $0x20] sm:$0xff] }
  0x8f   :  { %383 = vmatpush.msra.mxu1 %v336_v26  ;;  %v62_v26 = vld [vmem:[%s2202_s0 + $0x50] sm:$0xff] }
  0x91   :  { %384 = vmatpush.msra.mxu1 %v334_v29  ;;  %v65_v29 = vld [vmem:[%s2202_s0 + $0x68] sm:$0xff] }
  0x92   :  { %v99_v39 = vpop.permute.xlu1 %98 }
  0x93   :  { %vm127_vm11 = vcmp.eq.s32.totalorder %v99_v39, %v1729_v19  ;;  %v364_v39 = vld [vmem:[%s2206_s4] sm:$0x3] }
  0x94   :  { %v1396_v40 = vsel %vm127_vm11, 1.0, %v1617_v21  ;;  %v1948_v57 = vperm.slane %v364_v39, 0 }
  0x96   :  { %1407 = vmatmul.msk.f32.gmra.mxu0 %vm173_vm1, %v1390_v28  ;;  %v337_v28 = vld [vmem:[#allocation2 + $0x28] sm:$0xff] }
  0x97   :  { %424 = vmatpush.msra.mxu2 %v337_v28 }
  0x99   :  { %425 = vmatpush.msra.mxu2 %v335_v31 }
  0x9b   :  { %426 = vmatpush.msra.mxu2 %v333_v33 }
  0x9d   :  { %782 = vmatpush.msrb.mxu2 %v1776_v51 }
  0x9e   :  { %1408 = vmatmul.msk.f32.gmra.mxu0 %vm173_vm1, %v1391_v30  ;;  %v1867_v30 = vld [vmem:[%s2205_s3 + $0x28] sm:$0xff] }
  0x9f   :  { %504 = vmatpush.msrb.mxu3 %v1867_v30  ;;  %783 = vmatpush.msrb.mxu2 %v1782_v54 }
  0xa1   :  { %784 = vmatpush.msrb.mxu2 %v1788_v55 }
  0xa3   :  { %785 = vmatpush.msrb.mxu2 %v1795_v58 }
  0xa5   :  { %786 = vmatpush.msrb.mxu2 %v1802_v61 }
  0xa6   :  { %1409 = vmatmul.msk.f32.gmra.mxu0 %vm173_vm1, %v1392_v32  ;;  %v332_v32 = vld [vmem:[#allocation2] sm:$0xff] }
  0xa7   :  { %385 = vmatpush.msra.mxu1 %v332_v32  ;;  %787 = vmatpush.msrb.mxu2 %v1811_v1 }
  0xa9   :  { %701 = vmatpush.msrb.mxu1 %v1832_v10  ;;  %788 = vmatpush.msrb.mxu2 %v1818_v4 }
  0xab   :  { %702 = vmatpush.msrb.mxu1 %v1841_v14  ;;  %789 = vmatpush.msrb.mxu2 %v1825_v7 }
  0xad   :  { %703 = vmatpush.msrb.mxu1 %v1847_v17 }
  0xae   :  { %1410 = vmatmul.msk.f32.gmra.mxu0 %vm173_vm1, %v1393_v34  ;;  %v1874_v34 = vld [vmem:[%s2205_s3 + $0x18] sm:$0xff] }
  0xaf   :  { %505 = vmatpush.msrb.mxu3 %v1874_v34  ;;  %704 = vmatpush.msrb.mxu1 %v1853_v22 }
  0xb1   :  { %506 = vmatpush.msrb.mxu3 %v1880_v35  ;;  %705 = vmatpush.msrb.mxu1 %v1860_v27 }
  0xb2   :  { %507 = vmatmul.f32.vlgmr.msrb.gmra.mxu3 %v1617_v21 }
  0xb3   :  { %580 = vmatpush.msra.mxu3 %v1776_v51  ;;  %706 = vmatpush.msrb.mxu1 %v1867_v30 }
  0xb5   :  { %581 = vmatpush.msra.mxu3 %v1782_v54  ;;  %707 = vmatpush.msrb.mxu1 %v1874_v34 }
  0xb6   :  { %1411 = vmatmul.msk.f32.gmra.mxu0 %vm173_vm1, %v1394_v36 }
  0xb7   :  { %582 = vmatpush.msra.mxu3 %v1788_v55  ;;  %708 = vmatpush.msrb.mxu1 %v1880_v35 }
  0xb9   :  { %583 = vmatpush.msra.mxu3 %v1795_v58 }
  0xbb   :  { %584 = vmatpush.msra.mxu3 %v1802_v61 }
  0xbd   :  { %585 = vmatpush.msra.mxu3 %v1811_v1 }
  0xbe   :  { %1412 = vmatmul.msk.f32.gmra.mxu0 %vm173_vm1, %v1395_v38  ;;  %v488_v38 = vpop.f32.mrf.mxu3 }
  0xbf   :  { %586 = vmatpush.msra.mxu3 %v1818_v4 }
  0xc1   :  { %587 = vmatpush.msra.mxu3 %v1825_v7 }
  0xc3   :  { %600 = vmatpush.msrb.mxu3 %v1832_v10 }
  0xc5   :  { %601 = vmatpush.msrb.mxu3 %v1841_v14 }
  0xc6   :  { %1413 = vmatmul.msk.f32.gmra.mxu0 %vm173_vm1, %v1396_v40  ;;  %v1937_v40 = vperm.slane %v364_v39, 1  ;;  %v66_v39 = vld [vmem:[%s2202_s0 + $0x70] sm:$0xff] }
  0xc7   :  { %602 = vmatpush.msrb.mxu3 %v1847_v17 }
  0xc9   :  { %603 = vmatpush.msrb.mxu3 %v1853_v22 }
  0xcb   :  { %604 = vmatpush.msrb.mxu3 %v1860_v27 }
  0xcd   :  { %605 = vmatpush.msrb.mxu3 %v1867_v30 }
  0xcf   :  { %606 = vmatpush.msrb.mxu3 %v1874_v34 }
  0xd1   :  { %607 = vmatpush.msrb.mxu3 %v1880_v35 }
  0xfb   :  { %v1761_v41 = vpop.f32.mrf.mxu0 }
 0x103   :  { %v1763_v42 = vpop.f32.mrf.mxu0 }
 0x10b   :  { %v1765_v43 = vpop.f32.mrf.mxu0 }
 0x113   :  { %v1767_v44 = vpop.f32.mrf.mxu0 }
 0x11b   :  { %v1769_v45 = vpop.f32.mrf.mxu0 }
 0x123   :  { %v1771_v46 = vpop.f32.mrf.mxu0 }
 0x12b   :  { %v1804_v62 = vpop.f32.mrf.mxu0 }
 0x133   :  { %v1834_v11 = vpop.f32.mrf.mxu0 }
 0x135   :  { %v508_v47 = vpop.f32.mrf.mxu3 }
 0x13b   :  { %v267_v25 = vpop.f32.mrf.mxu0 }
 0x13c   :  { %299 = vrot.lane.b32.xlu0 %v267_v25, %s1618_s15 }
 0x143   :  { %v270_v52 = vpop.f32.mrf.mxu0 }
 0x1ae   :  { %v300_v36 = vpop.permute.xlu0 %299 }
 0x1af   :  { %v324_v37 = vsel %vm323_vm12, %v1761_v41, %v300_v36 }
 0x1b0   :  { %386 = vmatmul.f32.vlgmr.msra.gmra.mxu1 %v324_v37  ;;  %427 = vmatmul.f32.vlgmr.msra.gmra.mxu2 %v324_v37 }
 0x1b1   :  { %883 = vmatpush.msra.mxu1 %v1776_v51  ;;  %903 = vmatpush.msra.mxu2 %v1832_v10 }
 0x1b3   :  { %884 = vmatpush.msra.mxu1 %v1782_v54  ;;  %904 = vmatpush.msra.mxu2 %v1841_v14 }
 0x1b5   :  { %885 = vmatpush.msra.mxu1 %v1788_v55  ;;  %905 = vmatpush.msra.mxu2 %v1847_v17 }
 0x1b7   :  { %886 = vmatpush.msra.mxu1 %v1795_v58  ;;  %906 = vmatpush.msra.mxu2 %v1853_v22 }
 0x1b9   :  { %887 = vmatpush.msra.mxu1 %v1802_v61  ;;  %907 = vmatpush.msra.mxu2 %v1860_v27 }
 0x1bb   :  { %888 = vmatpush.msra.mxu1 %v1811_v1  ;;  %908 = vmatpush.msra.mxu2 %v1867_v30 }
 0x1bd   :  { %889 = vmatpush.msra.mxu1 %v1818_v4  ;;  %909 = vmatpush.msra.mxu2 %v1874_v34 }
 0x1bf   :  { %890 = vmatpush.msra.mxu1 %v1825_v7  ;;  %910 = vmatpush.msra.mxu2 %v1880_v35 }
 0x22d   :  { %v387_v59 = vpop.f32.mrf.mxu1 }
 0x22e   :  { %v388_v60 = vadd.f32 %v387_v59, %v1948_v57 }
 0x230   :  { %v511_v63 = vadd.f32 %v488_v38, %v388_v60  ;;  %v63_v38 = vld [vmem:[%s2202_s0 + $0x58] sm:$0xff] }
 0x232   :  { %v1420_v0 = vmul.f32 -1.442695, %v511_v63 }
 0x233   :  { %v428_v41 = vpop.f32.mrf.mxu2 }
 0x234   :  { %v429_v48 = vadd.f32 %v428_v41, %v1937_v40 }
 0x236   :  { %v512_v49 = vadd.f32 %v508_v47, %v429_v48 }
 0x238   :  { %1465 = vtanh.f32 %v512_v49  ;;  %v1421_v41 = vmul.f32 -1.442695, %v512_v49 }
 0x239   :  { %1467 = vpow2.f32 %v1420_v0 }
 0x23e   :  { %v1466_v50 = vpop.eup %1465 }
 0x23f   :  { %554 = vrot.lane.b32.xlu2 %v1466_v50, %s1618_s15  ;;  %v1468_v2 = vpop.eup %1467 }
 0x240   :  { %v519_v3 = vadd.f32 1.0, %v1468_v2 }
 0x242   :  { %1469 = vrcp.f32 %v519_v3  ;;  %v532_v13 = vand.u32 2147483648, %v519_v3  ;;  %vm526_vm14 = vweird.f32 %v519_v3  ;;  %v530_v15 = vand.u32 2147483647, %v519_v3 }
 0x244   :  { %v533_v18 = vor.u32 1.1754944e-38, %v532_v13  ;;  %vm531_vm0 = vcmp.eq.f32.partialorder %v530_v15, 8.507059e+37 }
 0x247   :  { %301 = vrot.lane.b32.xlu2 %v270_v52, %s1618_s15 }
 0x248   :  { %v1470_v5 = vpop.eup %1469 }
 0x249   :  { %v522_v6 = vmul.f32 %v1470_v5, %v519_v3  ;;  %vm527_vm13 = vweird.f32 %v1470_v5 }
 0x24a   :  { %vm528_vm15 = vmor %vm526_vm14, %vm527_vm13 }
 0x24b   :  { %v523_v8 = vsub.f32 1.0, %v522_v6 }
 0x24d   :  { %v524_v9 = vmul.f32 %v1470_v5, %v523_v8 }
 0x24f   :  { %107 = vperm.xlu2 %1463, %v64_v53   ;;  %v525_v12 = vadd.f32 %v1470_v5, %v524_v9 }
 0x251   :  { %v529_v16 = vsel %vm528_vm15, %v1470_v5, %v525_v12 }
 0x252   :  { %v534_v23 = vsel %vm531_vm0, %v533_v18, %v529_v16 }
 0x253   :  { %v552_v31 = vmul.f32 0.0, %v534_v23 }
 0x257   :  { %116 = vperm.xlu2 %1463, %v67_v56  }
 0x299   :  { %v555_v20 = vpop.permute.xlu2 %554 }
 0x29a   :  { %v557_v24 = vmul.f32 %v555_v20, %v534_v23 }
 0x29c   :  { %559 = vrot.lane.b32.xlu0 %v557_v24, %s1618_s15 }
 0x2a1   :  { %v302_v25 = vpop.permute.xlu2 %301 }
 0x2a2   :  { %v325_v28 = vsel %vm323_vm12, %v1763_v42, %v302_v25 }
 0x2a3   :  { %389 = vmatmul.f32.gmra.mxu1 %v325_v28  ;;  %430 = vmatmul.f32.gmra.mxu2 %v325_v28 }
 0x2a4   :  { %101 = vperm.xlu0 %1461, %v62_v26  }
 0x2a9   :  { %v108_v9 = vpop.permute.xlu2 %107 }
 0x2aa   :  { %vm130_vm8 = vcmp.eq.s32.totalorder %v108_v9, %v1729_v19 }
 0x2ab   :  { %v1399_v13 = vsel %vm130_vm8, 1.0, %v1617_v21 }
 0x2ac   :  { %110 = vperm.xlu0 %1461, %v65_v29  }
 0x2b1   :  { %v117_v23 = vpop.permute.xlu2 %116 }
 0x2b2   :  { %vm133_vm11 = vcmp.eq.s32.totalorder %v117_v23, %v1729_v19 }
 0x2b3   :  { %v1402_v24 = vsel %vm133_vm11, 1.0, %v1617_v21 }
 0x30e   :  { %v560_v32 = vpop.permute.xlu0 %559 }
 0x30f   :  { %v1960_v33 = vadd.f32 %v560_v32, %v552_v31 }
 0x311   :  { %1471 = vtanh.f32 %v1960_v33 }
 0x312   :  { %1473 = vpow2.f32 %v1421_v41 }
 0x316   :  { %v102_v36 = vpop.permute.xlu0 %101 }
 0x317   :  { %v1472_v37 = vpop.eup %1471  ;;  %vm128_vm2 = vcmp.eq.s32.totalorder %v102_v36, %v1729_v19 }
 0x318   :  { %v1397_v42 = vsel %vm128_vm2, 1.0, %v1617_v21  ;;  %565 = vrot.lane.b32.xlu1 %v1472_v37, %s1618_s15  ;;  %v1474_v47 = vpop.eup %1473 }
 0x319   :  { %1414 = vmatmul.msk.f32.gmra.mxu0 %vm173_vm1, %v1397_v42  ;;  %v520_v48 = vadd.f32 1.0, %v1474_v47 }
 0x31b   :  { %1475 = vrcp.f32 %v520_v48  ;;  %v547_v60 = vand.u32 2147483648, %v520_v48  ;;  %vm541_vm4 = vweird.f32 %v520_v48  ;;  %v545_v63 = vand.u32 2147483647, %v520_v48 }
 0x31d   :  { %v548_v2 = vor.u32 1.1754944e-38, %v547_v60  ;;  %vm546_vm6 = vcmp.eq.f32.partialorder %v545_v63, 8.507059e+37 }
 0x31e   :  { %v111_v15 = vpop.permute.xlu0 %110 }
 0x31f   :  { %vm131_vm9 = vcmp.eq.s32.totalorder %v111_v15, %v1729_v19 }
 0x320   :  { %104 = vperm.xlu1 %1462, %v63_v38   ;;  %v1400_v16 = vsel %vm131_vm9, 1.0, %v1617_v21  ;;  %v390_v38 = vpop.f32.mrf.mxu1 }
 0x321   :  { %v1476_v50 = vpop.eup %1475 }
 0x322   :  { %v537_v52 = vmul.f32 %v1476_v50, %v520_v48  ;;  %vm542_vm3 = vweird.f32 %v1476_v50 }
 0x323   :  { %vm543_vm5 = vmor %vm541_vm4, %vm542_vm3 }
 0x324   :  { %v538_v53 = vsub.f32 1.0, %v537_v52 }
 0x326   :  { %v539_v56 = vmul.f32 %v1476_v50, %v538_v53  ;;  %v431_v31 = vpop.f32.mrf.mxu2 }
 0x327   :  { %v432_v32 = vadd.f32 %v431_v31, %v1937_v40 }
 0x328   :  { %113 = vperm.xlu1 %1462, %v66_v39   ;;  %v540_v59 = vadd.f32 %v1476_v50, %v539_v56  ;;  %v391_v39 = vadd.f32 %v390_v38, %v1948_v57 }
 0x32a   :  { %v544_v0 = vsel %vm543_vm5, %v1476_v50, %v540_v59 }
 0x32b   :  { %v549_v3 = vsel %vm546_vm6, %v548_v2, %v544_v0 }
 0x38a   :  { %v566_v5 = vpop.permute.xlu1 %565 }
 0x38b   :  { %v568_v49 = vmul.f32 %v566_v5, %v549_v3 }
 0x38d   :  { %1422 = vmatmul.msk.f32.vlgmr.msra.gmra.mxu3 %vm323_vm12, %v568_v49 }
 0x38e   :  { %681 = vmatpush.msra.mxu3 %v1776_v51 }
 0x390   :  { %682 = vmatpush.msra.mxu3 %v1782_v54 }
 0x392   :  { %v105_v6 = vpop.permute.xlu1 %104  ;;  %683 = vmatpush.msra.mxu3 %v1788_v55 }
 0x393   :  { %vm129_vm7 = vcmp.eq.s32.totalorder %v105_v6, %v1729_v19 }
 0x394   :  { %v1398_v8 = vsel %vm129_vm7, 1.0, %v1617_v21  ;;  %684 = vmatpush.msra.mxu3 %v1795_v58 }
 0x395   :  { %1415 = vmatmul.msk.f32.gmra.mxu0 %vm173_vm1, %v1398_v8  ;;  %1423 = vmatmul.msk.f32.vlgmr.msrb.gmra.mxu3 %vm323_vm12, %v568_v49 }
 0x396   :  { %v273_v12 = vpop.f32.mrf.mxu0  ;;  %685 = vmatpush.msra.mxu3 %v1802_v61 }
 0x397   :  { %303 = vrot.lane.b32.xlu2 %v273_v12, %s1618_s15 }
 0x398   :  { %686 = vmatpush.msra.mxu3 %v1811_v1 }
 0x39a   :  { %687 = vmatpush.msra.mxu3 %v1818_v4  ;;  %v114_v18 = vpop.permute.xlu1 %113 }
 0x39b   :  { %vm132_vm10 = vcmp.eq.s32.totalorder %v114_v18, %v1729_v19 }
 0x39c   :  { %688 = vmatpush.msra.mxu3 %v1825_v7  ;;  %v1401_v20 = vsel %vm132_vm10, 1.0, %v1617_v21 }
 0x39d   :  { %1416 = vmatmul.msk.f32.gmra.mxu0 %vm173_vm1, %v1399_v13 }
 0x39e   :  { %802 = vmatpush.msrb.mxu3 %v1832_v10 }
 0x3a0   :  { %803 = vmatpush.msrb.mxu3 %v1841_v14 }
 0x3a2   :  { %804 = vmatpush.msrb.mxu3 %v1847_v17 }
 0x3a4   :  { %805 = vmatpush.msrb.mxu3 %v1853_v22 }
 0x3a5   :  { %1417 = vmatmul.msk.f32.gmra.mxu0 %vm173_vm1, %v1400_v16 }
 0x3a6   :  { %806 = vmatpush.msrb.mxu3 %v1860_v27 }
 0x3a8   :  { %807 = vmatpush.msrb.mxu3 %v1867_v30 }
 0x3aa   :  { %808 = vmatpush.msrb.mxu3 %v1874_v34 }
 0x3ac   :  { %809 = vmatpush.msrb.mxu3 %v1880_v35 }
 0x3ad   :  { %1418 = vmatmul.msk.f32.gmra.mxu0 %vm173_vm1, %v1401_v20 }
 0x3b5   :  { %1419 = vmatmul.msk.f32.gmra.mxu0 %vm173_vm1, %v1402_v24 }
 0x3f1   :  { %v304_v25 = vpop.permute.xlu2 %303 }
 0x3f2   :  { %v326_v26 = vsel %vm323_vm12, %v1765_v43, %v304_v25 }
 0x3f3   :  { %392 = vmatmul.f32.gmra.mxu1 %v326_v26  ;;  %433 = vmatmul.f32.gmra.mxu2 %v326_v26 }
 0x410   :  { %v589_v28 = vpop.f32.mrf.mxu3 }
 0x411   :  { %v612_v41 = vadd.f32 %v589_v28, %v391_v39 }
 0x412   :  { %v276_v29 = vpop.f32.mrf.mxu0 }
 0x413   :  { %v1424_v47 = vmul.f32 -1.442695, %v612_v41 }
 0x418   :  { %v609_v36 = vpop.f32.mrf.mxu3 }
 0x419   :  { %v2010_v37 = vadd.f32 %v609_v36, %v432_v32 }
 0x41a   :  { %v279_v42 = vpop.f32.mrf.mxu0 }
 0x41b   :  { %1477 = vtanh.f32 %v2010_v37  ;;  %v1425_v28 = vmul.f32 -1.442695, %v2010_v37 }
 0x41c   :  { %1479 = vpow2.f32 %v1424_v47 }
 0x421   :  { %v1478_v19 = vpop.eup %1477 }
 0x422   :  { %655 = vrot.lane.b32.xlu0 %v1478_v19, %s1618_s15  ;;  %v282_v21 = vpop.f32.mrf.mxu0  ;;  %v1480_v48 = vpop.eup %1479 }
 0x423   :  { %309 = vrot.lane.b32.xlu2 %v282_v21, %s1618_s15  ;;  %v620_v50 = vadd.f32 1.0, %v1480_v48 }
 0x425   :  { %1481 = vrcp.f32 %v620_v50  ;;  %v633_v63 = vand.u32 2147483648, %v620_v50  ;;  %vm627_vm13 = vweird.f32 %v620_v50  ;;  %v631_v0 = vand.u32 2147483647, %v620_v50 }
 0x427   :  { %v634_v3 = vor.u32 1.1754944e-38, %v633_v63  ;;  %vm632_vm15 = vcmp.eq.f32.partialorder %v631_v0, 8.507059e+37 }
 0x42a   :  { %305 = vrot.lane.b32.xlu0 %v276_v29, %s1618_s15  ;;  %v285_v43 = vpop.f32.mrf.mxu0 }
 0x42b   :  { %v1482_v52 = vpop.eup %1481 }
 0x42c   :  { %v623_v53 = vmul.f32 %v1482_v52, %v620_v50  ;;  %vm628_vm1 = vweird.f32 %v1482_v52 }
 0x42d   :  { %vm629_vm14 = vmor %vm627_vm13, %vm628_vm1 }
 0x42e   :  { %v624_v56 = vsub.f32 1.0, %v623_v53 }
 0x430   :  { %v625_v59 = vmul.f32 %v1482_v52, %v624_v56 }
 0x432   :  { %311 = vrot.lane.b32.xlu0 %v285_v43, %s1618_s15  ;;  %v626_v60 = vadd.f32 %v1482_v52, %v625_v59  ;;  %v288_v12 = vpop.f32.mrf.mxu0 }
 0x434   :  { %v630_v2 = vsel %vm629_vm14, %v1482_v52, %v626_v60 }
 0x435   :  { %v635_v49 = vsel %vm632_vm15, %v634_v3, %v630_v2 }
 0x436   :  { %v653_v13 = vmul.f32 %v635_v49, %v1960_v33 }
 0x470   :  { %v393_v41 = vpop.f32.mrf.mxu1 }
 0x471   :  { %v394_v3 = vadd.f32 %v393_v41, %v1948_v57 }
 0x476   :  { %v434_v56 = vpop.f32.mrf.mxu2 }
 0x477   :  { %v435_v59 = vadd.f32 %v434_v56, %v1937_v40 }
 0x494   :  { %v656_v5 = vpop.permute.xlu0 %655 }
 0x495   :  { %v658_v6 = vmul.f32 %v656_v5, %v635_v49 }
 0x497   :  { %660 = vrot.lane.b32.xlu1 %v658_v6, %s1618_s15 }
 0x49c   :  { %v306_v8 = vpop.permute.xlu0 %305 }
 0x49d   :  { %v327_v9 = vsel %vm323_vm12, %v1767_v44, %v306_v8  ;;  %v310_v44 = vpop.permute.xlu2 %309 }
 0x49e   :  { %395 = vmatmul.f32.gmra.mxu1 %v327_v9  ;;  %436 = vmatmul.f32.gmra.mxu2 %v327_v9  ;;  %v329_v24 = vsel %vm323_vm12, %v1771_v46, %v310_v44 }
 0x49f   :  { %307 = vrot.lane.b32.xlu1 %v279_v42, %s1618_s15 }
 0x4a4   :  { %v312_v33 = vpop.permute.xlu0 %311 }
 0x4a5   :  { %v330_v25 = vsel %vm323_vm12, %v1804_v62, %v312_v33 }
 0x4a7   :  { %313 = vrot.lane.b32.xlu1 %v288_v12, %s1618_s15 }
 0x509   :  { %v661_v15 = vpop.permute.xlu1 %660 }
 0x50a   :  { %v2024_v16 = vadd.f32 %v661_v15, %v653_v13 }
 0x50c   :  { %1483 = vtanh.f32 %v2024_v16 }
 0x50d   :  { %1485 = vpow2.f32 %v1425_v28 }
 0x511   :  { %v308_v18 = vpop.permute.xlu1 %307 }
 0x512   :  { %v1484_v20 = vpop.eup %1483  ;;  %v328_v23 = vsel %vm323_vm12, %v1769_v45, %v308_v18 }
 0x513   :  { %398 = vmatmul.f32.gmra.mxu1 %v328_v23  ;;  %439 = vmatmul.f32.gmra.mxu2 %v328_v23  ;;  %v1486_v29 = vpop.eup %1485 }
 0x514   :  { %666 = vrot.lane.b32.xlu2 %v1484_v20, %s1618_s15  ;;  %v621_v31 = vadd.f32 1.0, %v1486_v29 }
 0x516   :  { %1487 = vrcp.f32 %v621_v31  ;;  %v648_v62 = vand.u32 2147483648, %v621_v31  ;;  %vm642_vm2 = vweird.f32 %v621_v31  ;;  %v646_v21 = vand.u32 2147483647, %v621_v31 }
 0x518   :  { %vm647_vm4 = vcmp.eq.f32.partialorder %v646_v21, 8.507059e+37 }
 0x519   :  { %v314_v26 = vpop.permute.xlu1 %313 }
 0x51a   :  { %v331_v45 = vsel %vm323_vm12, %v1834_v11, %v314_v26  ;;  %v649_v11 = vor.u32 1.1754944e-38, %v648_v62 }
 0x51b   :  { %401 = vmatmul.f32.gmra.mxu1 %v329_v24  ;;  %442 = vmatmul.f32.gmra.mxu2 %v329_v24  ;;  %v2055_v47 = vpop.f32.mrf.mxu1 }
 0x51c   :  { %v1488_v46 = vpop.eup %1487 }
 0x51d   :  { %v638_v32 = vmul.f32 %v1488_v46, %v621_v31  ;;  %vm643_vm0 = vweird.f32 %v1488_v46 }
 0x51e   :  { %vm644_vm3 = vmor %vm642_vm2, %vm643_vm0 }
 0x51f   :  { %v639_v36 = vsub.f32 1.0, %v638_v32 }
 0x521   :  { %v640_v42 = vmul.f32 %v1488_v46, %v639_v36 }
 0x523   :  { %404 = vmatmul.f32.gmra.mxu1 %v330_v25  ;;  %445 = vmatmul.f32.gmra.mxu2 %v330_v25  ;;  %v641_v19 = vadd.f32 %v1488_v46, %v640_v42 }
 0x525   :  { %v645_v43 = vsel %vm644_vm3, %v1488_v46, %v641_v19 }
 0x526   :  { %v650_v38 = vsel %vm647_vm4, %v649_v11, %v645_v43 }
 0x52b   :  { %407 = vmatmul.f32.gmra.mxu1 %v331_v45  ;;  %448 = vmatmul.f32.gmra.mxu2 %v331_v45 }
 0x56e   :  { %v667_v39 = vpop.permute.xlu2 %666 }
 0x56f   :  { %v669_v37 = vmul.f32 %v667_v39, %v650_v38 }
 0x571   :  { %1426 = vmatmul.msk.f32.vlgmr.msra.gmra.mxu3 %vm323_vm12, %v669_v37  ;;  %1427 = vmatmul.msk.f32.vlgmr.msrb.gmra.mxu1 %vm323_vm12, %v669_v37 }
 0x572   :  { %984 = vmatpush.msra.mxu3 %v1776_v51  ;;  %1004 = vmatpush.msrb.mxu1 %v1832_v10 }
 0x574   :  { %985 = vmatpush.msra.mxu3 %v1782_v54  ;;  %1005 = vmatpush.msrb.mxu1 %v1841_v14 }
 0x576   :  { %986 = vmatpush.msra.mxu3 %v1788_v55  ;;  %1006 = vmatpush.msrb.mxu1 %v1847_v17 }
 0x578   :  { %987 = vmatpush.msra.mxu3 %v1795_v58  ;;  %1007 = vmatpush.msrb.mxu1 %v1853_v22 }
 0x57a   :  { %988 = vmatpush.msra.mxu3 %v1802_v61  ;;  %1008 = vmatpush.msrb.mxu1 %v1860_v27 }
 0x57c   :  { %989 = vmatpush.msra.mxu3 %v1811_v1  ;;  %1009 = vmatpush.msrb.mxu1 %v1867_v30 }
 0x57e   :  { %990 = vmatpush.msra.mxu3 %v1818_v4  ;;  %1010 = vmatpush.msrb.mxu1 %v1874_v34 }
 0x580   :  { %991 = vmatpush.msra.mxu3 %v1825_v7  ;;  %1011 = vmatpush.msrb.mxu1 %v1880_v35 }
 0x590   :  { %v2057_v48 = vpop.f32.mrf.mxu1 }
 0x598   :  { %v2059_v50 = vpop.f32.mrf.mxu1 }
 0x5a0   :  { %v2061_v52 = vpop.f32.mrf.mxu1 }
 0x5a8   :  { %v2063_v53 = vpop.f32.mrf.mxu1 }
 0x5ee   :  { %v710_v60 = vpop.f32.mrf.mxu1 }
 0x5ef   :  { %v714_v63 = vadd.f32 %v710_v60, %v435_v59 }
 0x5f1   :  { %1489 = vtanh.f32 %v714_v63  ;;  %v1429_v46 = vmul.f32 -1.442695, %v714_v63  ;;  %v397_v63 = vadd.f32 %v2055_v47, %v1948_v57 }
 0x5f4   :  { %v690_v2 = vpop.f32.mrf.mxu3 }
 0x5f5   :  { %v713_v5 = vadd.f32 %v690_v2, %v394_v3 }
 0x5f7   :  { %v1490_v0 = vpop.eup %1489  ;;  %v1428_v49 = vmul.f32 -1.442695, %v713_v5 }
 0x5f8   :  { %756 = vrot.lane.b32.xlu0 %v1490_v0, %s1618_s15 }
 0x5f9   :  { %1491 = vpow2.f32 %v1428_v49 }
 0x5ff   :  { %v1492_v6 = vpop.eup %1491 }
 0x600   :  { %v721_v8 = vadd.f32 1.0, %v1492_v6 }
 0x602   :  { %1493 = vrcp.f32 %v721_v8  ;;  %v734_v20 = vand.u32 2147483648, %v721_v8  ;;  %vm728_vm6 = vweird.f32 %v721_v8  ;;  %v732_v23 = vand.u32 2147483647, %v721_v8 }
 0x604   :  { %v735_v24 = vor.u32 1.1754944e-38, %v734_v20  ;;  %vm733_vm8 = vcmp.eq.f32.partialorder %v732_v23, 8.507059e+37 }
 0x608   :  { %v1494_v9 = vpop.eup %1493 }
 0x609   :  { %v724_v12 = vmul.f32 %v1494_v9, %v721_v8  ;;  %vm729_vm5 = vweird.f32 %v1494_v9 }
 0x60a   :  { %vm730_vm7 = vmor %vm728_vm6, %vm729_vm5 }
 0x60b   :  { %v725_v13 = vsub.f32 1.0, %v724_v12 }
 0x60d   :  { %v726_v15 = vmul.f32 %v1494_v9, %v725_v13 }
 0x60f   :  { %v727_v18 = vadd.f32 %v1494_v9, %v726_v15 }
 0x611   :  { %v731_v44 = vsel %vm730_vm7, %v1494_v9, %v727_v18 }
 0x612   :  { %v736_v33 = vsel %vm733_vm8, %v735_v24, %v731_v44 }
 0x613   :  { %v754_v45 = vmul.f32 %v736_v33, %v2024_v16 }
 0x66a   :  { %v757_v25 = vpop.permute.xlu0 %756 }
 0x66b   :  { %v759_v26 = vmul.f32 %v757_v25, %v736_v33 }
 0x66d   :  { %761 = vrot.lane.b32.xlu1 %v759_v26, %s1618_s15 }
 0x6df   :  { %v762_v28 = vpop.permute.xlu1 %761 }
 0x6e0   :  { %v2070_v29 = vadd.f32 %v762_v28, %v754_v45 }
 0x6e2   :  { %1495 = vtanh.f32 %v2070_v29 }
 0x6e3   :  { %1497 = vpow2.f32 %v1429_v46 }
 0x6e8   :  { %v1496_v31 = vpop.eup %1495 }
 0x6e9   :  { %767 = vrot.lane.b32.xlu2 %v1496_v31, %s1618_s15  ;;  %v1498_v32 = vpop.eup %1497 }
 0x6ea   :  { %v722_v36 = vadd.f32 1.0, %v1498_v32 }
 0x6ec   :  { %1499 = vrcp.f32 %v722_v36  ;;  %v749_v16 = vand.u32 2147483648, %v722_v36  ;;  %vm743_vm10 = vweird.f32 %v722_v36  ;;  %v747_v11 = vand.u32 2147483647, %v722_v36 }
 0x6ee   :  { %v750_v39 = vor.u32 1.1754944e-38, %v749_v16  ;;  %vm748_vm1 = vcmp.eq.f32.partialorder %v747_v11, 8.507059e+37 }
 0x6f2   :  { %v1500_v42 = vpop.eup %1499 }
 0x6f3   :  { %v739_v19 = vmul.f32 %v1500_v42, %v722_v36  ;;  %vm744_vm9 = vweird.f32 %v1500_v42 }
 0x6f4   :  { %vm745_vm11 = vmor %vm743_vm10, %vm744_vm9 }
 0x6f5   :  { %v740_v62 = vsub.f32 1.0, %v739_v19 }
 0x6f7   :  { %v741_v21 = vmul.f32 %v1500_v42, %v740_v62 }
 0x6f9   :  { %v742_v43 = vadd.f32 %v1500_v42, %v741_v21 }
 0x6fb   :  { %v746_v38 = vsel %vm745_vm11, %v1500_v42, %v742_v43 }
 0x6fc   :  { %v751_v41 = vsel %vm748_vm1, %v750_v39, %v746_v38 }
 0x743   :  { %v768_v37 = vpop.permute.xlu2 %767 }
 0x744   :  { %v770_v56 = vmul.f32 %v768_v37, %v751_v41 }
 0x746   :  { %1430 = vmatmul.msk.f32.vlgmr.msrb.gmra.mxu2 %vm323_vm12, %v770_v56  ;;  %1431 = vmatmul.msk.f32.vlgmr.msrb.gmra.mxu3 %vm323_vm12, %v770_v56 }
 0x747   :  { %1085 = vmatpush.msrb.mxu2 %v1776_v51  ;;  %1105 = vmatpush.msrb.mxu3 %v1832_v10  ;;  %v437_v51 = vpop.f32.mrf.mxu2 }
 0x749   :  { %1086 = vmatpush.msrb.mxu2 %v1782_v54  ;;  %1106 = vmatpush.msrb.mxu3 %v1841_v14  ;;  %v438_v54 = vadd.f32 %v437_v51, %v1937_v40 }
 0x74b   :  { %1087 = vmatpush.msrb.mxu2 %v1788_v55  ;;  %1107 = vmatpush.msrb.mxu3 %v1847_v17 }
 0x74d   :  { %1088 = vmatpush.msrb.mxu2 %v1795_v58  ;;  %1108 = vmatpush.msrb.mxu3 %v1853_v22 }
 0x74f   :  { %1089 = vmatpush.msrb.mxu2 %v1802_v61  ;;  %1109 = vmatpush.msrb.mxu3 %v1860_v27 }
 0x751   :  { %1090 = vmatpush.msrb.mxu2 %v1811_v1  ;;  %1110 = vmatpush.msrb.mxu3 %v1867_v30  ;;  %v2094_v1 = vpop.f32.mrf.mxu2 }
 0x752   :  { %v441_v39 = vadd.f32 %v2094_v1, %v1937_v40 }
 0x753   :  { %1091 = vmatpush.msrb.mxu2 %v1818_v4  ;;  %1111 = vmatpush.msrb.mxu3 %v1874_v34 }
 0x755   :  { %1092 = vmatpush.msrb.mxu2 %v1825_v7  ;;  %1112 = vmatpush.msrb.mxu3 %v1880_v35 }
 0x759   :  { %v2096_v59 = vpop.f32.mrf.mxu2 }
 0x761   :  { %v2098_v4 = vpop.f32.mrf.mxu2 }
 0x769   :  { %v2100_v60 = vpop.f32.mrf.mxu2 }
 0x7c9   :  { %v811_v55 = vpop.f32.mrf.mxu3  ;;  %v791_v7 = vpop.f32.mrf.mxu2 }
 0x7ca   :  { %v815_v58 = vadd.f32 %v811_v55, %v438_v54  ;;  %v814_v0 = vadd.f32 %v791_v7, %v397_v63 }
 0x7cc   :  { %1501 = vtanh.f32 %v815_v58  ;;  %v1432_v2 = vmul.f32 -1.442695, %v814_v0  ;;  %v1433_v45 = vmul.f32 -1.442695, %v815_v58 }
 0x7ce   :  { %1503 = vpow2.f32 %v1432_v2 }
 0x7d2   :  { %v1502_v61 = vpop.eup %1501 }
 0x7d3   :  { %857 = vrot.lane.b32.xlu0 %v1502_v61, %s1618_s15 }
 0x7d4   :  { %v1504_v3 = vpop.eup %1503 }
 0x7d5   :  { %v822_v5 = vadd.f32 1.0, %v1504_v3 }
 0x7d7   :  { %1505 = vrcp.f32 %v822_v5  ;;  %v835_v13 = vand.u32 2147483648, %v822_v5  ;;  %vm829_vm14 = vweird.f32 %v822_v5  ;;  %v833_v15 = vand.u32 2147483647, %v822_v5 }
 0x7d9   :  { %v836_v20 = vor.u32 1.1754944e-38, %v835_v13  ;;  %vm834_vm0 = vcmp.eq.f32.partialorder %v833_v15, 8.507059e+37 }
 0x7dd   :  { %v1506_v49 = vpop.eup %1505 }
 0x7de   :  { %v825_v6 = vmul.f32 %v1506_v49, %v822_v5  ;;  %vm830_vm13 = vweird.f32 %v1506_v49 }
 0x7df   :  { %vm831_vm15 = vmor %vm829_vm14, %vm830_vm13 }
 0x7e0   :  { %v826_v8 = vsub.f32 1.0, %v825_v6 }
 0x7e2   :  { %v827_v9 = vmul.f32 %v1506_v49, %v826_v8 }
 0x7e4   :  { %v828_v12 = vadd.f32 %v1506_v49, %v827_v9 }
 0x7e6   :  { %v832_v18 = vsel %vm831_vm15, %v1506_v49, %v828_v12 }
 0x7e7   :  { %v837_v23 = vsel %vm834_vm0, %v836_v20, %v832_v18 }
 0x7e8   :  { %v855_v24 = vmul.f32 %v837_v23, %v2070_v29 }
 0x845   :  { %v858_v47 = vpop.permute.xlu0 %857 }
 0x846   :  { %v860_v44 = vmul.f32 %v858_v47, %v837_v23 }
 0x848   :  { %862 = vrot.lane.b32.xlu1 %v860_v44, %s1618_s15 }
 0x8ba   :  { %v863_v33 = vpop.permute.xlu1 %862 }
 0x8bb   :  { %v2106_v25 = vadd.f32 %v863_v33, %v855_v24 }
 0x8bd   :  { %1507 = vtanh.f32 %v2106_v25 }
 0x8be   :  { %1509 = vpow2.f32 %v1433_v45  ;;  %v444_v45 = vadd.f32 %v2096_v59, %v1937_v40 }
 0x8c3   :  { %v1508_v26 = vpop.eup %1507 }
 0x8c4   :  { %868 = vrot.lane.b32.xlu2 %v1508_v26, %s1618_s15  ;;  %v1510_v28 = vpop.eup %1509 }
 0x8c5   :  { %v823_v31 = vadd.f32 1.0, %v1510_v28 }
 0x8c7   :  { %1511 = vrcp.f32 %v823_v31  ;;  %v850_v29 = vand.u32 2147483648, %v823_v31  ;;  %vm844_vm3 = vweird.f32 %v823_v31  ;;  %v848_v62 = vand.u32 2147483647, %v823_v31 }
 0x8c9   :  { %v851_v43 = vor.u32 1.1754944e-38, %v850_v29  ;;  %vm849_vm5 = vcmp.eq.f32.partialorder %v848_v62, 8.507059e+37 }
 0x8cd   :  { %v1512_v46 = vpop.eup %1511 }
 0x8ce   :  { %v840_v32 = vmul.f32 %v1512_v46, %v823_v31  ;;  %vm845_vm2 = vweird.f32 %v1512_v46 }
 0x8cf   :  { %vm846_vm4 = vmor %vm844_vm3, %vm845_vm2 }
 0x8d0   :  { %v841_v36 = vsub.f32 1.0, %v840_v32 }
 0x8d2   :  { %v842_v42 = vmul.f32 %v1512_v46, %v841_v36  ;;  %v403_v36 = vadd.f32 %v2059_v50, %v1948_v57 }
 0x8d4   :  { %v843_v19 = vadd.f32 %v1512_v46, %v842_v42 }
 0x8d6   :  { %v847_v21 = vsel %vm846_vm4, %v1512_v46, %v843_v19 }
 0x8d7   :  { %v852_v16 = vsel %vm849_vm5, %v851_v43, %v847_v21 }
 0x91e   :  { %v869_v11 = vpop.permute.xlu2 %868 }
 0x91f   :  { %v871_v38 = vmul.f32 %v869_v11, %v852_v16 }
 0x921   :  { %1434 = vmatmul.msk.f32.vlgmr.msra.gmra.mxu1 %vm323_vm12, %v871_v38  ;;  %1435 = vmatmul.msk.f32.vlgmr.msra.gmra.mxu2 %vm323_vm12, %v871_v38 }
 0x922   :  { %1206 = vmatpush.msra.mxu1 %v1832_v10 }
 0x924   :  { %1207 = vmatpush.msra.mxu1 %v1841_v14 }
 0x926   :  { %1208 = vmatpush.msra.mxu1 %v1847_v17  ;;  %v400_v17 = vadd.f32 %v2057_v48, %v1948_v57 }
 0x928   :  { %1209 = vmatpush.msra.mxu1 %v1853_v22 }
 0x92a   :  { %1210 = vmatpush.msra.mxu1 %v1860_v27 }
 0x92c   :  { %1211 = vmatpush.msra.mxu1 %v1867_v30 }
 0x92e   :  { %1212 = vmatpush.msra.mxu1 %v1874_v34 }
 0x930   :  { %1213 = vmatpush.msra.mxu1 %v1880_v35 }
 0x99e   :  { %v892_v14 = vpop.f32.mrf.mxu1 }
 0x99f   :  { %v915_v22 = vadd.f32 %v892_v14, %v400_v17 }
 0x9a1   :  { %v1436_v27 = vmul.f32 -1.442695, %v915_v22 }
 0x9a4   :  { %v912_v37 = vpop.f32.mrf.mxu2 }
 0x9a5   :  { %v916_v41 = vadd.f32 %v912_v37, %v441_v39 }
 0x9a7   :  { %1513 = vtanh.f32 %v916_v41  ;;  %v1437_v6 = vmul.f32 -1.442695, %v916_v41 }
 0x9a8   :  { %1515 = vpow2.f32 %v1436_v27 }
 0x9ad   :  { %v1514_v10 = vpop.eup %1513 }
 0x9ae   :  { %958 = vrot.lane.b32.xlu0 %v1514_v10, %s1618_s15  ;;  %v1516_v30 = vpop.eup %1515 }
 0x9af   :  { %v923_v34 = vadd.f32 1.0, %v1516_v30 }
 0x9b1   :  { %1517 = vrcp.f32 %v923_v34  ;;  %v936_v58 = vand.u32 2147483648, %v923_v34  ;;  %vm930_vm7 = vweird.f32 %v923_v34  ;;  %v934_v61 = vand.u32 2147483647, %v923_v34 }
 0x9b3   :  { %v937_v7 = vor.u32 1.1754944e-38, %v936_v58  ;;  %vm935_vm9 = vcmp.eq.f32.partialorder %v934_v61, 8.507059e+37 }
 0x9b7   :  { %v1518_v35 = vpop.eup %1517 }
 0x9b8   :  { %v926_v56 = vmul.f32 %v1518_v35, %v923_v34  ;;  %vm931_vm6 = vweird.f32 %v1518_v35 }
 0x9b9   :  { %vm932_vm8 = vmor %vm930_vm7, %vm931_vm6 }
 0x9ba   :  { %v927_v51 = vsub.f32 1.0, %v926_v56 }
 0x9bc   :  { %v928_v54 = vmul.f32 %v1518_v35, %v927_v51 }
 0x9be   :  { %v929_v55 = vadd.f32 %v1518_v35, %v928_v54 }
 0x9c0   :  { %v933_v1 = vsel %vm932_vm8, %v1518_v35, %v929_v55 }
 0x9c1   :  { %v938_v63 = vsel %vm935_vm9, %v937_v7, %v933_v1 }
 0x9c2   :  { %v956_v2 = vmul.f32 %v938_v63, %v2106_v25 }
 0xa20   :  { %v959_v48 = vpop.permute.xlu0 %958 }
 0xa21   :  { %v961_v0 = vmul.f32 %v959_v48, %v938_v63 }
 0xa23   :  { %963 = vrot.lane.b32.xlu1 %v961_v0, %s1618_s15 }
 0xa95   :  { %v964_v3 = vpop.permute.xlu1 %963 }
 0xa96   :  { %v966_v5 = vadd.f32 %v964_v3, %v956_v2 }
 0xa98   :  { %1519 = vtanh.f32 %v966_v5 }
 0xa99   :  { %1521 = vpow2.f32 %v1437_v6 }
 0xa9e   :  { %v1520_v49 = vpop.eup %1519 }
 0xa9f   :  { %969 = vrot.lane.b32.xlu2 %v1520_v49, %s1618_s15  ;;  %v1522_v8 = vpop.eup %1521 }
 0xaa0   :  { %v924_v9 = vadd.f32 1.0, %v1522_v8 }
 0xaa2   :  { %1523 = vrcp.f32 %v924_v9  ;;  %v951_v47 = vand.u32 2147483648, %v924_v9  ;;  %vm945_vm11 = vweird.f32 %v924_v9  ;;  %v949_v23 = vand.u32 2147483647, %v924_v9 }
 0xaa4   :  { %v952_v24 = vor.u32 1.1754944e-38, %v951_v47  ;;  %vm950_vm13 = vcmp.eq.f32.partialorder %v949_v23, 8.507059e+37 }
 0xaa8   :  { %v1524_v12 = vpop.eup %1523 }
 0xaa9   :  { %v941_v13 = vmul.f32 %v1524_v12, %v924_v9  ;;  %vm946_vm10 = vweird.f32 %v1524_v12 }
 0xaaa   :  { %vm947_vm1 = vmor %vm945_vm11, %vm946_vm10 }
 0xaab   :  { %v942_v15 = vsub.f32 1.0, %v941_v13 }
 0xaad   :  { %v943_v18 = vmul.f32 %v1524_v12, %v942_v15 }
 0xaaf   :  { %v944_v20 = vadd.f32 %v1524_v12, %v943_v18 }
 0xab1   :  { %v948_v44 = vsel %vm947_vm1, %v1524_v12, %v944_v20  ;;  %v406_v12 = vadd.f32 %v2061_v52, %v1948_v57 }
 0xab2   :  { %v953_v33 = vsel %vm950_vm13, %v952_v24, %v948_v44 }
 0xaf9   :  { %v970_v25 = vpop.permute.xlu2 %969 }
 0xafa   :  { %v972_v26 = vmul.f32 %v970_v25, %v953_v33 }
 0xafc   :  { %1438 = vmatmul.msk.f32.vlgmr.msra.gmra.mxu3 %vm323_vm12, %v972_v26  ;;  %1439 = vmatmul.msk.f32.vlgmr.msrb.gmra.mxu1 %vm323_vm12, %v972_v26 }
 0xb79   :  { %v1013_v28 = vpop.f32.mrf.mxu1 }
 0xb7a   :  { %v1017_v31 = vadd.f32 %v1013_v28, %v444_v45 }
 0xb7c   :  { %1525 = vtanh.f32 %v1017_v31  ;;  %v1441_v34 = vmul.f32 -1.442695, %v1017_v31 }
 0xb7f   :  { %v993_v32 = vpop.f32.mrf.mxu3 }
 0xb80   :  { %v1016_v42 = vadd.f32 %v993_v32, %v403_v36 }
 0xb82   :  { %v1526_v46 = vpop.eup %1525  ;;  %v1440_v19 = vmul.f32 -1.442695, %v1016_v42 }
 0xb83   :  { %1059 = vrot.lane.b32.xlu0 %v1526_v46, %s1618_s15 }
 0xb84   :  { %1527 = vpow2.f32 %v1440_v19 }
 0xb8a   :  { %v1528_v29 = vpop.eup %1527 }
 0xb8b   :  { %v1024_v62 = vadd.f32 1.0, %v1528_v29 }
 0xb8d   :  { %1529 = vrcp.f32 %v1024_v62  ;;  %v1037_v38 = vand.u32 2147483648, %v1024_v62  ;;  %vm1031_vm15 = vweird.f32 %v1024_v62  ;;  %v1035_v39 = vand.u32 2147483647, %v1024_v62 }
 0xb8f   :  { %v1038_v41 = vor.u32 1.1754944e-38, %v1037_v38  ;;  %vm1036_vm2 = vcmp.eq.f32.partialorder %v1035_v39, 8.507059e+37 }
 0xb93   :  { %v1530_v21 = vpop.eup %1529 }
 0xb94   :  { %v1027_v43 = vmul.f32 %v1530_v21, %v1024_v62  ;;  %vm1032_vm14 = vweird.f32 %v1530_v21 }
 0xb95   :  { %vm1033_vm0 = vmor %vm1031_vm15, %vm1032_vm14 }
 0xb96   :  { %v1028_v16 = vsub.f32 1.0, %v1027_v43 }
 0xb98   :  { %v1029_v59 = vmul.f32 %v1530_v21, %v1028_v16 }
 0xb9a   :  { %v1030_v11 = vadd.f32 %v1530_v21, %v1029_v59 }
 0xb9c   :  { %v1034_v37 = vsel %vm1033_vm0, %v1530_v21, %v1030_v11 }
 0xb9d   :  { %v1039_v10 = vsel %vm1036_vm2, %v1038_v41, %v1034_v37 }
 0xb9e   :  { %v1057_v17 = vmul.f32 %v1039_v10, %v966_v5  ;;  %v447_v5 = vadd.f32 %v2098_v4, %v1937_v40 }
 0xbf5   :  { %v1060_v50 = vpop.permute.xlu0 %1059 }
 0xbf6   :  { %v1062_v14 = vmul.f32 %v1060_v50, %v1039_v10 }
 0xbf8   :  { %1064 = vrot.lane.b32.xlu1 %v1062_v14, %s1618_s15 }
 0xc6a   :  { %v1065_v22 = vpop.permute.xlu1 %1064 }
 0xc6b   :  { %v1067_v27 = vadd.f32 %v1065_v22, %v1057_v17  ;;  %v450_v17 = vadd.f32 %v2100_v60, %v1937_v40 }
 0xc6d   :  { %1531 = vtanh.f32 %v1067_v27 }
 0xc6e   :  { %1533 = vpow2.f32 %v1441_v34 }
 0xc73   :  { %v1532_v30 = vpop.eup %1531 }
 0xc74   :  { %1070 = vrot.lane.b32.xlu2 %v1532_v30, %s1618_s15  ;;  %v1534_v35 = vpop.eup %1533 }
 0xc75   :  { %v1025_v56 = vadd.f32 1.0, %v1534_v35  ;;  %v409_v35 = vadd.f32 %v2063_v53, %v1948_v57 }
 0xc77   :  { %1535 = vrcp.f32 %v1025_v56  ;;  %v1052_v1 = vand.u32 2147483648, %v1025_v56  ;;  %vm1046_vm4 = vweird.f32 %v1025_v56  ;;  %v1050_v7 = vand.u32 2147483647, %v1025_v56 }
 0xc79   :  { %v1053_v63 = vor.u32 1.1754944e-38, %v1052_v1  ;;  %vm1051_vm6 = vcmp.eq.f32.partialorder %v1050_v7, 8.507059e+37 }
 0xc7d   :  { %v1536_v51 = vpop.eup %1535 }
 0xc7e   :  { %v1042_v54 = vmul.f32 %v1536_v51, %v1025_v56  ;;  %vm1047_vm3 = vweird.f32 %v1536_v51 }
 0xc7f   :  { %vm1048_vm5 = vmor %vm1046_vm4, %vm1047_vm3 }
 0xc80   :  { %v1043_v55 = vsub.f32 1.0, %v1042_v54 }
 0xc82   :  { %v1044_v58 = vmul.f32 %v1536_v51, %v1043_v55 }
 0xc84   :  { %v1045_v61 = vadd.f32 %v1536_v51, %v1044_v58 }
 0xc86   :  { %v1049_v48 = vsel %vm1048_vm5, %v1536_v51, %v1045_v61 }
 0xc87   :  { %v1054_v0 = vsel %vm1051_vm6, %v1053_v63, %v1049_v48 }
 0xcce   :  { %v1071_v2 = vpop.permute.xlu2 %1070 }
 0xccf   :  { %v1073_v3 = vmul.f32 %v1071_v2, %v1054_v0 }
 0xcd1   :  { %1442 = vmatmul.msk.f32.vlgmr.msrb.gmra.mxu2 %vm323_vm12, %v1073_v3  ;;  %1443 = vmatmul.msk.f32.vlgmr.msrb.gmra.mxu3 %vm323_vm12, %v1073_v3  ;;  %v1283_v3 = vld [vmem:[%s2207_s5 + $0x38] sm:$0xff] }
 0xcd2   :  { %1295 = vmatpush.msra.mxu2 %v1283_v3 }
 0xd54   :  { %v1114_v49 = vpop.f32.mrf.mxu3  ;;  %v1094_v9 = vpop.f32.mrf.mxu2 }
 0xd55   :  { %v1118_v6 = vadd.f32 %v1114_v49, %v447_v5  ;;  %v1117_v13 = vadd.f32 %v1094_v9, %v406_v12  ;;  %v1282_v5 = vld [vmem:[%s2207_s5 + $0x30] sm:$0xff]  ;;  %v1281_v49 = vld [vmem:[%s2207_s5 + $0x28] sm:$0xff] }
 0xd56   :  { %1296 = vmatpush.msra.mxu2 %v1282_v5  ;;  %v1278_v9 = vld [vmem:[%s2207_s5 + $0x10] sm:$0xff]  ;;  %v1277_v12 = vld [vmem:[%s2207_s5 + $0x8] sm:$0xff] }
 0xd57   :  { %1537 = vtanh.f32 %v1118_v6  ;;  %v1444_v15 = vmul.f32 -1.442695, %v1117_v13  ;;  %v1445_v19 = vmul.f32 -1.442695, %v1118_v6  ;;  %v1280_v6 = vld [vmem:[%s2207_s5 + $0x20] sm:$0xff] }
 0xd58   :  { %1297 = vmatpush.msra.mxu2 %v1281_v49 }
 0xd59   :  { %1539 = vpow2.f32 %v1444_v15 }
 0xd5a   :  { %1298 = vmatpush.msra.mxu2 %v1280_v6 }
 0xd5d   :  { %v1538_v8 = vpop.eup %1537 }
 0xd5e   :  { %1160 = vrot.lane.b32.xlu0 %v1538_v8, %s1618_s15  ;;  %v1279_v8 = vld [vmem:[%s2207_s5 + $0x18] sm:$0xff] }
 0xd5f   :  { %v1540_v18 = vpop.eup %1539  ;;  %1299 = vmatpush.msra.mxu2 %v1279_v8 }
 0xd60   :  { %v1125_v20 = vadd.f32 1.0, %v1540_v18 }
 0xd61   :  { %1300 = vmatpush.msra.mxu2 %v1278_v9 }
 0xd62   :  { %1541 = vrcp.f32 %v1125_v20  ;;  %v1138_v33 = vand.u32 2147483648, %v1125_v20  ;;  %vm1132_vm8 = vweird.f32 %v1125_v20  ;;  %v1136_v25 = vand.u32 2147483647, %v1125_v20 }
 0xd63   :  { %1301 = vmatpush.msra.mxu2 %v1277_v12 }
 0xd64   :  { %v1139_v45 = vor.u32 1.1754944e-38, %v1138_v33  ;;  %vm1137_vm10 = vcmp.eq.f32.partialorder %v1136_v25, 8.507059e+37 }
 0xd68   :  { %v1542_v47 = vpop.eup %1541 }
 0xd69   :  { %v1128_v23 = vmul.f32 %v1542_v47, %v1125_v20  ;;  %vm1133_vm7 = vweird.f32 %v1542_v47 }
 0xd6a   :  { %vm1134_vm9 = vmor %vm1132_vm8, %vm1133_vm7  ;;  %vm1310_vm8 = vcmask 64512  }
 0xd6b   :  { %v1129_v44 = vsub.f32 1.0, %v1128_v23 }
 0xd6d   :  { %v1130_v4 = vmul.f32 %v1542_v47, %v1129_v44 }
 0xd6f   :  { %v1131_v24 = vadd.f32 %v1542_v47, %v1130_v4  ;;  %v1276_v4 = vld [vmem:[%s2207_s5] sm:$0xff] }
 0xd70   :  { %1302 = vmatpush.msra.mxu2 %v1276_v4 }
 0xd71   :  { %v1135_v26 = vsel %vm1134_vm9, %v1542_v47, %v1131_v24  ;;  %vm1344_vm9 = vcmask 1040384  }
 0xd72   :  { %v1140_v28 = vsel %vm1137_vm10, %v1139_v45, %v1135_v26  ;;  %vm1368_vm10 = vcmask 17408  }
 0xd73   :  { %v1158_v46 = vmul.f32 %v1140_v28, %v1067_v27 }
 0xdd0   :  { %v1161_v52 = vpop.permute.xlu0 %1160 }
 0xdd1   :  { %v1163_v31 = vmul.f32 %v1161_v52, %v1140_v28 }
 0xdd3   :  { %1165 = vrot.lane.b32.xlu1 %v1163_v31, %s1618_s15 }
 0xe45   :  { %v1166_v32 = vpop.permute.xlu1 %1165 }
 0xe46   :  { %v2145_v36 = vadd.f32 %v1166_v32, %v1158_v46 }
 0xe48   :  { %1543 = vtanh.f32 %v2145_v36 }
 0xe49   :  { %1545 = vpow2.f32 %v1445_v19  ;;  %v1308_v19 = vld [vmem:[%s2208_s6] sm:$0xff] }
 0xe4e   :  { %v1544_v42 = vpop.eup %1543 }
 0xe4f   :  { %1171 = vrot.lane.b32.xlu2 %v1544_v42, %s1618_s15  ;;  %v1546_v29 = vpop.eup %1545 }
 0xe50   :  { %v1126_v62 = vadd.f32 1.0, %v1546_v29 }
 0xe52   :  { %1547 = vrcp.f32 %v1126_v62  ;;  %v1153_v38 = vand.u32 2147483648, %v1126_v62  ;;  %vm1147_vm1 = vweird.f32 %v1126_v62  ;;  %v1151_v39 = vand.u32 2147483647, %v1126_v62 }
 0xe54   :  { %v1154_v41 = vor.u32 1.1754944e-38, %v1153_v38  ;;  %vm1152_vm14 = vcmp.eq.f32.partialorder %v1151_v39, 8.507059e+37 }
 0xe58   :  { %v1548_v21 = vpop.eup %1547 }
 0xe59   :  { %v1143_v43 = vmul.f32 %v1548_v21, %v1126_v62  ;;  %vm1148_vm11 = vweird.f32 %v1548_v21 }
 0xe5a   :  { %vm1149_vm13 = vmor %vm1147_vm1, %vm1148_vm11 }
 0xe5b   :  { %v1144_v16 = vsub.f32 1.0, %v1143_v43  ;;  %v1335_v43 = vld [vmem:[%s2210_s8 + $0x8] sm:$0x1] }
 0xe5d   :  { %v1145_v59 = vmul.f32 %v1548_v21, %v1144_v16  ;;  %v1334_v16 = vld [vmem:[%s2210_s8] sm:$0xff] }
 0xe5f   :  { %v1146_v11 = vadd.f32 %v1548_v21, %v1145_v59 }
 0xe61   :  { %v1150_v37 = vsel %vm1149_vm13, %v1548_v21, %v1146_v11  ;;  %v1307_v21 = vld [vmem:[%s2209_s7] sm:$0x3]  ;;  %s1619_s7 = smov [#allocation5]  }
 0xe62   :  { %v1155_v50 = vsel %vm1152_vm14, %v1154_v41, %v1150_v37  ;;  %v1464_v11 = vld [vmem:[%s2211_s9] ss:$0 sm:$0xff]  ;;  %s1375_s1 = sshll.u32 %s1619_s7, 4  ;;  %s1376_s1 = int_to_ptr.vmem [resolvable:$true] %s1375_s1 }
 0xea9   :  { %v1172_v10 = vpop.permute.xlu2 %1171 }
 0xeaa   :  { %v1174_v14 = vmul.f32 %v1172_v10, %v1155_v50 }
 0xeac   :  { %1446 = vmatmul.msk.f32.vlgmr.msrb.gmra.mxu0 %vm323_vm12, %v1174_v14  ;;  %1447 = vmatmul.msk.f32.vlgmr.msra.gmra.mxu1 %vm323_vm12, %v1174_v14 }
 0xf29   :  { %v1215_v22 = vpop.f32.mrf.mxu1  ;;  %v1195_v34 = vpop.f32.mrf.mxu0 }
 0xf2a   :  { %v1219_v27 = vadd.f32 %v1215_v22, %v450_v17  ;;  %v1218_v56 = vadd.f32 %v1195_v34, %v409_v35 }
 0xf2c   :  { %1549 = vtanh.f32 %v1219_v27  ;;  %v1448_v51 = vmul.f32 -1.442695, %v1218_v56  ;;  %v1449_v47 = vmul.f32 -1.442695, %v1219_v27 }
 0xf2e   :  { %1551 = vpow2.f32 %v1448_v51 }
 0xf32   :  { %v1550_v30 = vpop.eup %1549 }
 0xf33   :  { %1261 = vrot.lane.b32.xlu0 %v1550_v30, %s1618_s15 }
 0xf34   :  { %v1552_v54 = vpop.eup %1551 }
 0xf35   :  { %v1226_v55 = vadd.f32 1.0, %v1552_v54 }
 0xf37   :  { %1553 = vrcp.f32 %v1226_v55  ;;  %v1239_v7 = vand.u32 2147483648, %v1226_v55  ;;  %vm1233_vm0 = vweird.f32 %v1226_v55  ;;  %v1237_v48 = vand.u32 2147483647, %v1226_v55 }
 0xf39   :  { %v1240_v0 = vor.u32 1.1754944e-38, %v1239_v7  ;;  %vm1238_vm3 = vcmp.eq.f32.partialorder %v1237_v48, 8.507059e+37 }
 0xf3d   :  { %v1554_v58 = vpop.eup %1553 }
 0xf3e   :  { %v1229_v61 = vmul.f32 %v1554_v58, %v1226_v55  ;;  %vm1234_vm15 = vweird.f32 %v1554_v58 }
 0xf3f   :  { %vm1235_vm2 = vmor %vm1233_vm0, %vm1234_vm15 }
 0xf40   :  { %v1230_v1 = vsub.f32 1.0, %v1229_v61 }
 0xf42   :  { %v1231_v40 = vmul.f32 %v1554_v58, %v1230_v1 }
 0xf44   :  { %v1232_v60 = vadd.f32 %v1554_v58, %v1231_v40 }
 0xf46   :  { %v1236_v63 = vsel %vm1235_vm2, %v1554_v58, %v1232_v60 }
 0xf47   :  { %v1241_v53 = vsel %vm1238_vm3, %v1240_v0, %v1236_v63 }
 0xf48   :  { %v1259_v13 = vmul.f32 %v1241_v53, %v2145_v36 }
 0xfa5   :  { %v1262_v57 = vpop.permute.xlu0 %1261 }
 0xfa6   :  { %v1264_v2 = vmul.f32 %v1262_v57, %v1241_v53 }
 0xfa8   :  { %1266 = vrot.lane.b32.xlu1 %v1264_v2, %s1618_s15 }
0x101a   :  { %v1267_v15 = vpop.permute.xlu1 %1266 }
0x101b   :  { %v1269_v18 = vadd.f32 %v1267_v15, %v1259_v13 }
0x101d   :  { %1555 = vtanh.f32 %v1269_v18 }
0x101e   :  { %1557 = vpow2.f32 %v1449_v47 }
0x1023   :  { %v1556_v20 = vpop.eup %1555 }
0x1024   :  { %1272 = vrot.lane.b32.xlu2 %v1556_v20, %s1618_s15  ;;  %v1558_v23 = vpop.eup %1557 }
0x1025   :  { %v1227_v44 = vadd.f32 1.0, %v1558_v23 }
0x1027   :  { %1559 = vrcp.f32 %v1227_v44  ;;  %v1254_v52 = vand.u32 2147483648, %v1227_v44  ;;  %vm1248_vm5 = vweird.f32 %v1227_v44  ;;  %v1252_v28 = vand.u32 2147483647, %v1227_v44 }
0x1029   :  { %v1255_v46 = vor.u32 1.1754944e-38, %v1254_v52  ;;  %vm1253_vm7 = vcmp.eq.f32.partialorder %v1252_v28, 8.507059e+37 }
0x102d   :  { %v1560_v24 = vpop.eup %1559 }
0x102e   :  { %v1244_v33 = vmul.f32 %v1560_v24, %v1227_v44  ;;  %vm1249_vm4 = vweird.f32 %v1560_v24 }
0x102f   :  { %vm1250_vm6 = vmor %vm1248_vm5, %vm1249_vm4 }
0x1030   :  { %v1245_v25 = vsub.f32 1.0, %v1244_v33 }
0x1032   :  { %v1246_v26 = vmul.f32 %v1560_v24, %v1245_v25 }
0x1034   :  { %v1247_v45 = vadd.f32 %v1560_v24, %v1246_v26 }
0x1036   :  { %v1251_v31 = vsel %vm1250_vm6, %v1560_v24, %v1247_v45 }
0x1037   :  { %v1256_v32 = vsel %vm1253_vm7, %v1255_v46, %v1251_v31 }
0x107e   :  { %v1273_v36 = vpop.permute.xlu2 %1272 }
0x107f   :  { %v1275_v42 = vmul.f32 %v1273_v36, %v1256_v32 }
0x1081   :  { %1450 = vmatmul.msk.f32.vlgmr.msra.gmra.mxu2 %vm323_vm12, %v1275_v42  ;;  %vm1340_vm12 = vcmask 72704  }
0x1104   :  { %v1304_v29 = vpop.f32.mrf.mxu2 }
0x1105   :  { %v1309_v62 = vmul.f32 %v1308_v19, %v1304_v29 }
0x1107   :  { %1329 = vmatpush.msra.mxu3 %v1309_v62 }
0x1108   :  { %1451 = vmatmul.msk.f32.vlgmr.msra.gmra.mxu3 %vm1310_vm8, %v1307_v21 }
0x1109   :  { %1452 = vmatpush.msk.msrb.mxu3 %vm1344_vm9, %v1335_v43 }
0x110b   :  { %1363 = vmatpush.msrb.mxu3 %v1334_v16 }
0x118b   :  { %v1331_v59 = vpop.f32.mrf.mxu3 }
0x118c   :  { %1453 = vmatmul.msk.f32.vlgmr.msrb.gmra.mxu3 %vm1340_vm12, %v1331_v59 }
0x120f   :  { %v1365_v38 = vpop.f32.mrf.mxu3 }
0x1210   :  { %v1366_v39 = vadd.f32 %v1464_v11, %v1365_v38 }
0x1212   :  { %1369 = vst.msk [vmem:[#allocation5] sm:$0x3] %vm1368_vm10, %v1366_v39 }
0x1213   :  { %1380 = dma.vmem_to_hbm [thread:$0]  %s1376_s1, 32, %s1378_s13, [#allocation4]  }
0x1214   :  { %1611 = dma.done.wait [#allocation4], 32  }
0x1215   :  { %1612 = vsyncadd [#allocation4], 4294967264 }
0x1216   :  { %1385 = vsyncpa [#allocation3], 1 }
0x1217   :  { %1386 = vsyncpa [#allocation4], 1 }

</bundles_post_ra>
